<compile_context>
chip_gen: v7x
topology: tpu7x:2x2x1
jax: 0.10.0
libtpu: 0.0.40
codegen_flags: <defaults>
</compile_context>

<pallas_src>
import jax
import jax.numpy as jnp
from jax.experimental import pallas as pl
from jax.experimental.pallas import tpu as pltpu

# ----------------------------- model hyper-params ---------------------------
VOCAB = 32        # vocab_size
EMB_DIM = 16      # tok_emb_dim
RNN_DIM = 32      # rnn_dim
NUM_LAYERS = 2    # num_layers
PADDING_IDX = 0   # padding_idx

BATCH = 2         # N
SEQ = 8           # T


# ------------------------------- Pallas kernel ------------------------------
def _make_kernel(T, N, L, H, temperature):
    inv_temp = float(1.0 / temperature)

    def kernel(x_ref, h0_ref, c0_ref, wih_ref, whh_ref, b_ref,
               wdec_ref, bdec_ref,
               logp_ref, hout_ref, cout_ref, xbuf):
        # x_ref:    (T*N, H)    time-major embeddings (E zero-padded to H)
        # wih_ref:  (L, H, 4H)  stacked input->gate weights (transposed, padded)
        # whh_ref:  (L, H, 4H)  stacked hidden->gate weights (transposed)
        # b_ref:    (L, 1, 4H)  b_ih + b_hh
        # wdec_ref: (H, VPAD)   decoder weight, vocab padded to 128 lanes
        # bdec_ref: (1, VPAD)   decoder bias, padded lanes = -1e30
        # logp_ref: (T*N, VPAD) lane-dense log-prob output slab
        # hout/cout:(L, N, H)   final hidden / cell state
        # xbuf:     VMEM (T*N, H) per-layer output slab (next layer's input)

        layer_in = x_ref[...]                                        # (T*N, H)
        for l in range(L):
            # batched input projection across all time steps: one MXU push
            z = (jnp.dot(layer_in, wih_ref[l],
                         preferred_element_type=jnp.float32)
                 + b_ref[l])                                         # (T*N, 4H)
            whh = whh_ref[l]                                         # (H, 4H)
            h = h0_ref[l]                                            # (N, H)
            c = c0_ref[l]                                            # (N, H)
            for t in range(T):                                       # unrolled
                gates = z[t * N:(t + 1) * N, :] + jnp.dot(
                    h, whh, preferred_element_type=jnp.float32)      # (N, 4H)
                i_g = jax.nn.sigmoid(gates[:, 0 * H:1 * H])
                f_g = jax.nn.sigmoid(gates[:, 1 * H:2 * H])
                g_g = jnp.tanh(gates[:, 2 * H:3 * H])
                o_g = jax.nn.sigmoid(gates[:, 3 * H:4 * H])
                c = f_g * c + i_g * g_g
                h = o_g * jnp.tanh(c)
                xbuf[pl.ds(t * N, N), :] = h                         # layer output
            hout_ref[l] = h
            cout_ref[l] = c
            layer_in = xbuf[...]                                     # (T*N, H)

        # BottledLinear + temperature + log_softmax, once, lane-dense output
        logits = (jnp.dot(layer_in, wdec_ref[...],
                          preferred_element_type=jnp.float32)
                  + bdec_ref[...])                                   # (T*N, VPAD)
        if inv_temp != 1.0:
            logits = logits * inv_temp
        m = jnp.max(logits, axis=-1, keepdims=True)
        shifted = logits - m
        logp = shifted - jnp.log(jnp.sum(jnp.exp(shifted), axis=-1,
                                         keepdims=True))
        logp_ref[...] = logp.astype(logp_ref.dtype)

    return kernel


# --------------------------------- wrapper ----------------------------------
def rnn_generator_forward(toks, params, prev_state=None, temperature=1.0):
    """toks: (N, T) int32.  Returns (log_probs (T, N, V), (h, c) each (L, N, H))."""
    emb = params["tok_emb"]                                          # (V, E)
    V, E = emb.shape
    L = len(params["w_ih"])
    H = params["w_hh"][0].shape[1]
    N, T = toks.shape
    VPAD = ((V + 127) // 128) * 128
    assert E <= H, "kernel packs layer-0 W_ih into an (H, 4H) slab; needs E <= H"

    # Embedding table padded to H columns so every layer input is (., H);
    # time-major flattening is done on the tiny int token matrix only.
    emb_pad = jnp.zeros((V, H), jnp.float32).at[:, :E].set(emb.astype(jnp.float32))
    toks_tm = jnp.transpose(toks, (1, 0)).reshape(T * N)
    wembs = emb_pad[toks_tm]                                         # (T*N, H)

    if prev_state is None:
        h0 = jnp.zeros((L, N, H), jnp.float32)
        c0 = jnp.zeros((L, N, H), jnp.float32)
    else:
        h0 = prev_state[0].astype(jnp.float32)
        c0 = prev_state[1].astype(jnp.float32)

    wih = jnp.stack([
        jnp.zeros((H, 4 * H), jnp.float32)
        .at[:params["w_ih"][l].shape[1], :]
        .set(params["w_ih"][l].T.astype(jnp.float32))
        for l in range(L)])                                          # (L, H, 4H)
    whh = jnp.stack([params["w_hh"][l].T.astype(jnp.float32)
                     for l in range(L)])                             # (L, H, 4H)
    bias = jnp.stack([(params["b_ih"][l] + params["b_hh"][l])[None, :]
                      .astype(jnp.float32) for l in range(L)])       # (L, 1, 4H)

    wdec = jnp.zeros((H, VPAD), jnp.float32).at[:, :V].set(
        params["w_dec"].T.astype(jnp.float32))                       # (H, VPAD)
    bdec = jnp.full((1, VPAD), -1e30, jnp.float32).at[0, :V].set(
        params["b_dec"].astype(jnp.float32))                         # (1, VPAD)

    kernel = _make_kernel(T, N, L, H, float(temperature))

    lp_flat, h_out, c_out = pl.pallas_call(
        kernel,
        out_shape=[
            jax.ShapeDtypeStruct((T * N, VPAD), jnp.float32),
            jax.ShapeDtypeStruct((L, N, H), jnp.float32),
            jax.ShapeDtypeStruct((L, N, H), jnp.float32),
        ],
        grid_spec=pltpu.PrefetchScalarGridSpec(
            num_scalar_prefetch=0,
            grid=(1,),                                   # single kernel step
            in_specs=[
                pl.BlockSpec((T * N, H), lambda i: (0, 0)),
                pl.BlockSpec((L, N, H), lambda i: (0, 0, 0)),
                pl.BlockSpec((L, N, H), lambda i: (0, 0, 0)),
                pl.BlockSpec((L, H, 4 * H), lambda i: (0, 0, 0)),
                pl.BlockSpec((L, H, 4 * H), lambda i: (0, 0, 0)),
                pl.BlockSpec((L, 1, 4 * H), lambda i: (0, 0, 0)),
                pl.BlockSpec((H, VPAD), lambda i: (0, 0)),
                pl.BlockSpec((1, VPAD), lambda i: (0, 0)),
            ],
            out_specs=[
                pl.BlockSpec((T * N, VPAD), lambda i: (0, 0)),
                pl.BlockSpec((L, N, H), lambda i: (0, 0, 0)),
                pl.BlockSpec((L, N, H), lambda i: (0, 0, 0)),
            ],
            scratch_shapes=[pltpu.VMEM((T * N, H), jnp.float32)],
        ),
        compiler_params=pltpu.CompilerParams(
            dimension_semantics=("arbitrary",)),
    )(wembs, h0, c0, wih, whh, bias, wdec, bdec)

    log_probs = lp_flat.reshape(T, N, VPAD)[:, :, :V]
    return log_probs, (h_out, c_out)


# --------------------------- deterministic params ---------------------------
def init_params(key):
    ks = jax.random.split(key, 4 + 4 * NUM_LAYERS)
    scale = 0.1
    tok_emb = scale * jax.random.normal(ks[0], (VOCAB, EMB_DIM), jnp.float32)
    tok_emb = tok_emb.at[PADDING_IDX].set(0.0)   # nn.Embedding padding_idx

    w_ih, w_hh, b_ih, b_hh = [], [], [], []
    for l in range(NUM_LAYERS):
        in_dim = EMB_DIM if l == 0 else RNN_DIM
        kw = ks[4 + 4 * l: 4 + 4 * (l + 1)]
        w_ih.append(scale * jax.random.normal(kw[0], (4 * RNN_DIM, in_dim), jnp.float32))
        w_hh.append(scale * jax.random.normal(kw[1], (4 * RNN_DIM, RNN_DIM), jnp.float32))
        b_ih.append(scale * jax.random.normal(kw[2], (4 * RNN_DIM,), jnp.float32))
        b_hh.append(scale * jax.random.normal(kw[3], (4 * RNN_DIM,), jnp.float32))

    w_dec = scale * jax.random.normal(ks[1], (VOCAB, RNN_DIM), jnp.float32)
    b_dec = scale * jax.random.normal(ks[2], (VOCAB,), jnp.float32)

    return {"tok_emb": tok_emb, "w_ih": w_ih, "w_hh": w_hh,
            "b_ih": b_ih, "b_hh": b_hh, "w_dec": w_dec, "b_dec": b_dec}


# ------------------------------ pure-JAX reference ---------------------------
def reference_forward(toks, params, prev_state=None, temperature=1.0):
    emb = params["tok_emb"]
    L = len(params["w_ih"])
    H = params["w_hh"][0].shape[1]
    N, T = toks.shape
    layer_in = jnp.transpose(emb[toks], (1, 0, 2)).astype(jnp.float32)  # (T,N,E)
    if prev_state is None:
        hs = [jnp.zeros((N, H), jnp.float32) for _ in range(L)]
        cs = [jnp.zeros((N, H), jnp.float32) for _ in range(L)]
    else:
        hs = [prev_state[0][l] for l in range(L)]
        cs = [prev_state[1][l] for l in range(L)]
    for l in range(L):
        wih, whh = params["w_ih"][l], params["w_hh"][l]
        b = params["b_ih"][l] + params["b_hh"][l]
        h, c = hs[l], cs[l]
        outs = []
        for t in range(T):
            g = layer_in[t] @ wih.T + h @ whh.T + b
            i_g = jax.nn.sigmoid(g[:, :H])
            f_g = jax.nn.sigmoid(g[:, H:2 * H])
            g_g = jnp.tanh(g[:, 2 * H:3 * H])
            o_g = jax.nn.sigmoid(g[:, 3 * H:])
            c = f_g * c + i_g * g_g
            h = o_g * jnp.tanh(c)
            outs.append(h)
        layer_in = jnp.stack(outs)
        hs[l], cs[l] = h, c
    logits = jnp.einsum('tnh,vh->tnv', layer_in, params["w_dec"]) + params["b_dec"]
    logits = logits / temperature
    return jax.nn.log_softmax(logits, axis=-1), (jnp.stack(hs), jnp.stack(cs))


# ---------------------------------- main -------------------------------------
if __name__ == "__main__":
    key = jax.random.PRNGKey(0)
    pkey, tkey = jax.random.split(key)
    params = init_params(pkey)

    toks = jax.random.randint(tkey, (BATCH, SEQ), 0, VOCAB, dtype=jnp.int32)  # N*T

    log_probs, (h_n, c_n) = rnn_generator_forward(toks, params,
                                                  prev_state=None,
                                                  temperature=1.0)
    jax.block_until_ready((log_probs, h_n, c_n))

    assert log_probs.shape == (SEQ, BATCH, VOCAB)
    assert h_n.shape == (NUM_LAYERS, BATCH, RNN_DIM)
    assert c_n.shape == (NUM_LAYERS, BATCH, RNN_DIM)
    # log_softmax rows must sum (in prob space) to ~1
    row_sums = jnp.exp(log_probs).sum(-1)
    assert bool(jnp.all(jnp.abs(row_sums - 1.0) < 1e-4))

    # compare against a pure-JAX reference (loose tol: MXU vs XLA f32 paths)
    ref_lp, (ref_h, ref_c) = reference_forward(toks, params, None, 1.0)
    assert bool(jnp.allclose(log_probs, ref_lp, atol=1e-2, rtol=1e-2))
    assert bool(jnp.allclose(h_n, ref_h, atol=1e-2, rtol=1e-2))
    assert bool(jnp.allclose(c_n, ref_c, atol=1e-2, rtol=1e-2))

    # TODO(synk): rollout() (multinomial sampling loop + RNG-state capture) is
    # host-side control flow and is not part of the forward hot path; not ported.
    print("KERNEL_OK")
</pallas_src>

<mosaic_0001>
module attributes {stable_mosaic.version = 11 : i64} {
  func.func @kernel(%arg0: i32, %arg1: memref<16x32xf32, #tpu.memory_space<vmem>>, %arg2: memref<2x2x32xf32, #tpu.memory_space<vmem>>, %arg3: memref<2x2x32xf32, #tpu.memory_space<vmem>>, %arg4: memref<2x32x128xf32, #tpu.memory_space<vmem>>, %arg5: memref<2x32x128xf32, #tpu.memory_space<vmem>>, %arg6: memref<2x1x128xf32, #tpu.memory_space<vmem>>, %arg7: memref<32x128xf32, #tpu.memory_space<vmem>>, %arg8: memref<1x128xf32, #tpu.memory_space<vmem>>, %arg9: memref<16x128xf32, #tpu.memory_space<vmem>>, %arg10: memref<2x2x32xf32, #tpu.memory_space<vmem>>, %arg11: memref<2x2x32xf32, #tpu.memory_space<vmem>>, %arg12: memref<16x32xf32, #tpu.memory_space<vmem>>) attributes {dimension_semantics = [#tpu.dimension_semantics<arbitrary>], iteration_bounds = array<i64: 1>, scalar_prefetch = 0 : i64, scratch_operands = 1 : i64, tpu.core_type = #tpu.core_type<tc>, window_params = [{pipeline_mode = #tpu.pipeline_mode<synchronous>, transform_indices = @transform_0, window_bounds = array<i64: 16, 32>}, {pipeline_mode = #tpu.pipeline_mode<synchronous>, transform_indices = @transform_1, window_bounds = array<i64: 2, 2, 32>}, {pipeline_mode = #tpu.pipeline_mode<synchronous>, transform_indices = @transform_2, window_bounds = array<i64: 2, 2, 32>}, {pipeline_mode = #tpu.pipeline_mode<synchronous>, transform_indices = @transform_3, window_bounds = array<i64: 2, 32, 128>}, {pipeline_mode = #tpu.pipeline_mode<synchronous>, transform_indices = @transform_4, window_bounds = array<i64: 2, 32, 128>}, {pipeline_mode = #tpu.pipeline_mode<synchronous>, transform_indices = @transform_5, window_bounds = array<i64: 2, 1, 128>}, {pipeline_mode = #tpu.pipeline_mode<synchronous>, transform_indices = @transform_6, window_bounds = array<i64: 32, 128>}, {pipeline_mode = #tpu.pipeline_mode<synchronous>, transform_indices = @transform_7, window_bounds = array<i64: 1, 128>}, {pipeline_mode = #tpu.pipeline_mode<synchronous>, transform_indices = @transform_8, window_bounds = array<i64: 16, 128>}, {pipeline_mode = #tpu.pipeline_mode<synchronous>, transform_indices = @transform_9, window_bounds = array<i64: 2, 2, 32>}, {pipeline_mode = #tpu.pipeline_mode<synchronous>, transform_indices = @transform_10, window_bounds = array<i64: 2, 2, 32>}]} {
    %c0 = arith.constant 0 : index
    %c0_0 = arith.constant 0 : index
    %0 = vector.load %arg1[%c0, %c0_0] : memref<16x32xf32, #tpu.memory_space<vmem>>, vector<16x32xf32>
    %c0_1 = arith.constant 0 : index
    %c0_2 = arith.constant 0 : index
    %c0_3 = arith.constant 0 : index
    %1 = vector.load %arg4[%c0_1, %c0_2, %c0_3] : memref<2x32x128xf32, #tpu.memory_space<vmem>>, vector<1x32x128xf32>
    %2 = vector.shape_cast %1 : vector<1x32x128xf32> to vector<32x128xf32>
    %cst = arith.constant dense<0.000000e+00> : vector<16x128xf32>
    %3 = tpu.matmul %0, %2, %cst {dimension_numbers = #tpu.dot_dimension_numbers<[1], [0], [0], [1], [0, 0, 1, 1], [], []>} : vector<16x32xf32>, vector<32x128xf32>, vector<16x128xf32> -> vector<16x128xf32>
    %c0_4 = arith.constant 0 : index
    %c0_5 = arith.constant 0 : index
    %c0_6 = arith.constant 0 : index
    %4 = vector.load %arg6[%c0_4, %c0_5, %c0_6] : memref<2x1x128xf32, #tpu.memory_space<vmem>>, vector<1x1x128xf32>
    %5 = vector.shape_cast %4 : vector<1x1x128xf32> to vector<1x128xf32>
    %6 = vector.broadcast %5 : vector<1x128xf32> to vector<16x128xf32>
    %7 = arith.addf %3, %6 : vector<16x128xf32>
    %c0_7 = arith.constant 0 : index
    %c0_8 = arith.constant 0 : index
    %c0_9 = arith.constant 0 : index
    %8 = vector.load %arg5[%c0_7, %c0_8, %c0_9] : memref<2x32x128xf32, #tpu.memory_space<vmem>>, vector<1x32x128xf32>
    %9 = vector.shape_cast %8 : vector<1x32x128xf32> to vector<32x128xf32>
    %c0_10 = arith.constant 0 : index
    %c0_11 = arith.constant 0 : index
    %c0_12 = arith.constant 0 : index
    %10 = vector.load %arg2[%c0_10, %c0_11, %c0_12] : memref<2x2x32xf32, #tpu.memory_space<vmem>>, vector<1x2x32xf32>
    %11 = vector.shape_cast %10 : vector<1x2x32xf32> to vector<2x32xf32>
    %c0_13 = arith.constant 0 : index
    %c0_14 = arith.constant 0 : index
    %c0_15 = arith.constant 0 : index
    %12 = vector.load %arg3[%c0_13, %c0_14, %c0_15] : memref<2x2x32xf32, #tpu.memory_space<vmem>>, vector<1x2x32xf32>
    %13 = vector.shape_cast %12 : vector<1x2x32xf32> to vector<2x32xf32>
    %14 = vector.extract_strided_slice %7 {offsets = [0, 0], sizes = [2, 128], strides = [1, 1]} : vector<16x128xf32> to vector<2x128xf32>
    %cst_16 = arith.constant dense<0.000000e+00> : vector<2x128xf32>
    %15 = tpu.matmul %11, %9, %cst_16 {dimension_numbers = #tpu.dot_dimension_numbers<[1], [0], [0], [1], [0, 0, 1, 1], [], []>} : vector<2x32xf32>, vector<32x128xf32>, vector<2x128xf32> -> vector<2x128xf32>
    %16 = arith.addf %14, %15 : vector<2x128xf32>
    %17 = vector.extract_strided_slice %16 {offsets = [0, 0], sizes = [2, 32], strides = [1, 1]} : vector<2x128xf32> to vector<2x32xf32>
    %18 = arith.negf %17 : vector<2x32xf32>
    %19 = math.exp %18 : vector<2x32xf32>
    %cst_17 = arith.constant 1.000000e+00 : f32
    %20 = vector.broadcast %cst_17 : f32 to vector<2x32xf32>
    %21 = arith.addf %20, %19 : vector<2x32xf32>
    %22 = arith.divf %20, %21 : vector<2x32xf32>
    %23 = vector.extract_strided_slice %16 {offsets = [0, 32], sizes = [2, 32], strides = [1, 1]} : vector<2x128xf32> to vector<2x32xf32>
    %24 = arith.negf %23 : vector<2x32xf32>
    %25 = math.exp %24 : vector<2x32xf32>
    %cst_18 = arith.constant 1.000000e+00 : f32
    %26 = vector.broadcast %cst_18 : f32 to vector<2x32xf32>
    %27 = arith.addf %26, %25 : vector<2x32xf32>
    %28 = arith.divf %26, %27 : vector<2x32xf32>
    %29 = vector.extract_strided_slice %16 {offsets = [0, 64], sizes = [2, 32], strides = [1, 1]} : vector<2x128xf32> to vector<2x32xf32>
    %30 = math.tanh %29 : vector<2x32xf32>
    %31 = vector.extract_strided_slice %16 {offsets = [0, 96], sizes = [2, 32], strides = [1, 1]} : vector<2x128xf32> to vector<2x32xf32>
    %32 = arith.negf %31 : vector<2x32xf32>
    %33 = math.exp %32 : vector<2x32xf32>
    %cst_19 = arith.constant 1.000000e+00 : f32
    %34 = vector.broadcast %cst_19 : f32 to vector<2x32xf32>
    %35 = arith.addf %34, %33 : vector<2x32xf32>
    %36 = arith.divf %34, %35 : vector<2x32xf32>
    %37 = arith.mulf %28, %13 : vector<2x32xf32>
    %38 = arith.mulf %22, %30 : vector<2x32xf32>
    %39 = arith.addf %37, %38 : vector<2x32xf32>
    %40 = math.tanh %39 : vector<2x32xf32>
    %41 = arith.mulf %36, %40 : vector<2x32xf32>
    %c0_20 = arith.constant 0 : index
    %c0_21 = arith.constant 0 : index
    %42 = vector.load %arg12[%c0_20, %c0_21] : memref<16x32xf32, #tpu.memory_space<vmem>>, vector<2x32xf32>
    tpu.vector_store %arg12[%c0_20, %c0_21], %41 {strides = array<i32>} : memref<16x32xf32, #tpu.memory_space<vmem>>, vector<2x32xf32>,
    %43 = vector.extract_strided_slice %7 {offsets = [2, 0], sizes = [2, 128], strides = [1, 1]} : vector<16x128xf32> to vector<2x128xf32>
    %cst_22 = arith.constant dense<0.000000e+00> : vector<2x128xf32>
    %44 = tpu.matmul %41, %9, %cst_22 {dimension_numbers = #tpu.dot_dimension_numbers<[1], [0], [0], [1], [0, 0, 1, 1], [], []>} : vector<2x32xf32>, vector<32x128xf32>, vector<2x128xf32> -> vector<2x128xf32>
    %45 = arith.addf %43, %44 : vector<2x128xf32>
    %46 = vector.extract_strided_slice %45 {offsets = [0, 0], sizes = [2, 32], strides = [1, 1]} : vector<2x128xf32> to vector<2x32xf32>
    %47 = arith.negf %46 : vector<2x32xf32>
    %48 = math.exp %47 : vector<2x32xf32>
    %cst_23 = arith.constant 1.000000e+00 : f32
    %49 = vector.broadcast %cst_23 : f32 to vector<2x32xf32>
    %50 = arith.addf %49, %48 : vector<2x32xf32>
    %51 = arith.divf %49, %50 : vector<2x32xf32>
    %52 = vector.extract_strided_slice %45 {offsets = [0, 32], sizes = [2, 32], strides = [1, 1]} : vector<2x128xf32> to vector<2x32xf32>
    %53 = arith.negf %52 : vector<2x32xf32>
    %54 = math.exp %53 : vector<2x32xf32>
    %cst_24 = arith.constant 1.000000e+00 : f32
    %55 = vector.broadcast %cst_24 : f32 to vector<2x32xf32>
    %56 = arith.addf %55, %54 : vector<2x32xf32>
    %57 = arith.divf %55, %56 : vector<2x32xf32>
    %58 = vector.extract_strided_slice %45 {offsets = [0, 64], sizes = [2, 32], strides = [1, 1]} : vector<2x128xf32> to vector<2x32xf32>
    %59 = math.tanh %58 : vector<2x32xf32>
    %60 = vector.extract_strided_slice %45 {offsets = [0, 96], sizes = [2, 32], strides = [1, 1]} : vector<2x128xf32> to vector<2x32xf32>
    %61 = arith.negf %60 : vector<2x32xf32>
    %62 = math.exp %61 : vector<2x32xf32>
    %cst_25 = arith.constant 1.000000e+00 : f32
    %63 = vector.broadcast %cst_25 : f32 to vector<2x32xf32>
    %64 = arith.addf %63, %62 : vector<2x32xf32>
    %65 = arith.divf %63, %64 : vector<2x32xf32>
    %66 = arith.mulf %57, %39 : vector<2x32xf32>
    %67 = arith.mulf %51, %59 : vector<2x32xf32>
    %68 = arith.addf %66, %67 : vector<2x32xf32>
    %69 = math.tanh %68 : vector<2x32xf32>
    %70 = arith.mulf %65, %69 : vector<2x32xf32>
    %c2 = arith.constant 2 : index
    %c0_26 = arith.constant 0 : index
    %71 = vector.load %arg12[%c2, %c0_26] : memref<16x32xf32, #tpu.memory_space<vmem>>, vector<2x32xf32>
    tpu.vector_store %arg12[%c2, %c0_26], %70 {strides = array<i32>} : memref<16x32xf32, #tpu.memory_space<vmem>>, vector<2x32xf32>,
    %72 = vector.extract_strided_slice %7 {offsets = [4, 0], sizes = [2, 128], strides = [1, 1]} : vector<16x128xf32> to vector<2x128xf32>
    %cst_27 = arith.constant dense<0.000000e+00> : vector<2x128xf32>
    %73 = tpu.matmul %70, %9, %cst_27 {dimension_numbers = #tpu.dot_dimension_numbers<[1], [0], [0], [1], [0, 0, 1, 1], [], []>} : vector<2x32xf32>, vector<32x128xf32>, vector<2x128xf32> -> vector<2x128xf32>
    %74 = arith.addf %72, %73 : vector<2x128xf32>
    %75 = vector.extract_strided_slice %74 {offsets = [0, 0], sizes = [2, 32], strides = [1, 1]} : vector<2x128xf32> to vector<2x32xf32>
    %76 = arith.negf %75 : vector<2x32xf32>
    %77 = math.exp %76 : vector<2x32xf32>
    %cst_28 = arith.constant 1.000000e+00 : f32
    %78 = vector.broadcast %cst_28 : f32 to vector<2x32xf32>
    %79 = arith.addf %78, %77 : vector<2x32xf32>
    %80 = arith.divf %78, %79 : vector<2x32xf32>
    %81 = vector.extract_strided_slice %74 {offsets = [0, 32], sizes = [2, 32], strides = [1, 1]} : vector<2x128xf32> to vector<2x32xf32>
    %82 = arith.negf %81 : vector<2x32xf32>
    %83 = math.exp %82 : vector<2x32xf32>
    %cst_29 = arith.constant 1.000000e+00 : f32
    %84 = vector.broadcast %cst_29 : f32 to vector<2x32xf32>
    %85 = arith.addf %84, %83 : vector<2x32xf32>
    %86 = arith.divf %84, %85 : vector<2x32xf32>
    %87 = vector.extract_strided_slice %74 {offsets = [0, 64], sizes = [2, 32], strides = [1, 1]} : vector<2x128xf32> to vector<2x32xf32>
    %88 = math.tanh %87 : vector<2x32xf32>
    %89 = vector.extract_strided_slice %74 {offsets = [0, 96], sizes = [2, 32], strides = [1, 1]} : vector<2x128xf32> to vector<2x32xf32>
    %90 = arith.negf %89 : vector<2x32xf32>
    %91 = math.exp %90 : vector<2x32xf32>
    %cst_30 = arith.constant 1.000000e+00 : f32
    %92 = vector.broadcast %cst_30 : f32 to vector<2x32xf32>
    %93 = arith.addf %92, %91 : vector<2x32xf32>
    %94 = arith.divf %92, %93 : vector<2x32xf32>
    %95 = arith.mulf %86, %68 : vector<2x32xf32>
    %96 = arith.mulf %80, %88 : vector<2x32xf32>
    %97 = arith.addf %95, %96 : vector<2x32xf32>
    %98 = math.tanh %97 : vector<2x32xf32>
    %99 = arith.mulf %94, %98 : vector<2x32xf32>
    %c4 = arith.constant 4 : index
    %c0_31 = arith.constant 0 : index
    %100 = vector.load %arg12[%c4, %c0_31] : memref<16x32xf32, #tpu.memory_space<vmem>>, vector<2x32xf32>
    tpu.vector_store %arg12[%c4, %c0_31], %99 {strides = array<i32>} : memref<16x32xf32, #tpu.memory_space<vmem>>, vector<2x32xf32>,
    %101 = vector.extract_strided_slice %7 {offsets = [6, 0], sizes = [2, 128], strides = [1, 1]} : vector<16x128xf32> to vector<2x128xf32>
    %cst_32 = arith.constant dense<0.000000e+00> : vector<2x128xf32>
    %102 = tpu.matmul %99, %9, %cst_32 {dimension_numbers = #tpu.dot_dimension_numbers<[1], [0], [0], [1], [0, 0, 1, 1], [], []>} : vector<2x32xf32>, vector<32x128xf32>, vector<2x128xf32> -> vector<2x128xf32>
    %103 = arith.addf %101, %102 : vector<2x128xf32>
    %104 = vector.extract_strided_slice %103 {offsets = [0, 0], sizes = [2, 32], strides = [1, 1]} : vector<2x128xf32> to vector<2x32xf32>
    %105 = arith.negf %104 : vector<2x32xf32>
    %106 = math.exp %105 : vector<2x32xf32>
    %cst_33 = arith.constant 1.000000e+00 : f32
    %107 = vector.broadcast %cst_33 : f32 to vector<2x32xf32>
    %108 = arith.addf %107, %106 : vector<2x32xf32>
    %109 = arith.divf %107, %108 : vector<2x32xf32>
    %110 = vector.extract_strided_slice %103 {offsets = [0, 32], sizes = [2, 32], strides = [1, 1]} : vector<2x128xf32> to vector<2x32xf32>
    %111 = arith.negf %110 : vector<2x32xf32>
    %112 = math.exp %111 : vector<2x32xf32>
    %cst_34 = arith.constant 1.000000e+00 : f32
    %113 = vector.broadcast %cst_34 : f32 to vector<2x32xf32>
    %114 = arith.addf %113, %112 : vector<2x32xf32>
    %115 = arith.divf %113, %114 : vector<2x32xf32>
    %116 = vector.extract_strided_slice %103 {offsets = [0, 64], sizes = [2, 32], strides = [1, 1]} : vector<2x128xf32> to vector<2x32xf32>
    %117 = math.tanh %116 : vector<2x32xf32>
    %118 = vector.extract_strided_slice %103 {offsets = [0, 96], sizes = [2, 32], strides = [1, 1]} : vector<2x128xf32> to vector<2x32xf32>
    %119 = arith.negf %118 : vector<2x32xf32>
    %120 = math.exp %119 : vector<2x32xf32>
    %cst_35 = arith.constant 1.000000e+00 : f32
    %121 = vector.broadcast %cst_35 : f32 to vector<2x32xf32>
    %122 = arith.addf %121, %120 : vector<2x32xf32>
    %123 = arith.divf %121, %122 : vector<2x32xf32>
    %124 = arith.mulf %115, %97 : vector<2x32xf32>
    %125 = arith.mulf %109, %117 : vector<2x32xf32>
    %126 = arith.addf %124, %125 : vector<2x32xf32>
    %127 = math.tanh %126 : vector<2x32xf32>
    %128 = arith.mulf %123, %127 : vector<2x32xf32>
    %c6 = arith.constant 6 : index
    %c0_36 = arith.constant 0 : index
    %129 = vector.load %arg12[%c6, %c0_36] : memref<16x32xf32, #tpu.memory_space<vmem>>, vector<2x32xf32>
    tpu.vector_store %arg12[%c6, %c0_36], %128 {strides = array<i32>} : memref<16x32xf32, #tpu.memory_space<vmem>>, vector<2x32xf32>,
    %130 = vector.extract_strided_slice %7 {offsets = [8, 0], sizes = [2, 128], strides = [1, 1]} : vector<16x128xf32> to vector<2x128xf32>
    %cst_37 = arith.constant dense<0.000000e+00> : vector<2x128xf32>
    %131 = tpu.matmul %128, %9, %cst_37 {dimension_numbers = #tpu.dot_dimension_numbers<[1], [0], [0], [1], [0, 0, 1, 1], [], []>} : vector<2x32xf32>, vector<32x128xf32>, vector<2x128xf32> -> vector<2x128xf32>
    %132 = arith.addf %130, %131 : vector<2x128xf32>
    %133 = vector.extract_strided_slice %132 {offsets = [0, 0], sizes = [2, 32], strides = [1, 1]} : vector<2x128xf32> to vector<2x32xf32>
    %134 = arith.negf %133 : vector<2x32xf32>
    %135 = math.exp %134 : vector<2x32xf32>
    %cst_38 = arith.constant 1.000000e+00 : f32
    %136 = vector.broadcast %cst_38 : f32 to vector<2x32xf32>
    %137 = arith.addf %136, %135 : vector<2x32xf32>
    %138 = arith.divf %136, %137 : vector<2x32xf32>
    %139 = vector.extract_strided_slice %132 {offsets = [0, 32], sizes = [2, 32], strides = [1, 1]} : vector<2x128xf32> to vector<2x32xf32>
    %140 = arith.negf %139 : vector<2x32xf32>
    %141 = math.exp %140 : vector<2x32xf32>
    %cst_39 = arith.constant 1.000000e+00 : f32
    %142 = vector.broadcast %cst_39 : f32 to vector<2x32xf32>
    %143 = arith.addf %142, %141 : vector<2x32xf32>
    %144 = arith.divf %142, %143 : vector<2x32xf32>
    %145 = vector.extract_strided_slice %132 {offsets = [0, 64], sizes = [2, 32], strides = [1, 1]} : vector<2x128xf32> to vector<2x32xf32>
    %146 = math.tanh %145 : vector<2x32xf32>
    %147 = vector.extract_strided_slice %132 {offsets = [0, 96], sizes = [2, 32], strides = [1, 1]} : vector<2x128xf32> to vector<2x32xf32>
    %148 = arith.negf %147 : vector<2x32xf32>
    %149 = math.exp %148 : vector<2x32xf32>
    %cst_40 = arith.constant 1.000000e+00 : f32
    %150 = vector.broadcast %cst_40 : f32 to vector<2x32xf32>
    %151 = arith.addf %150, %149 : vector<2x32xf32>
    %152 = arith.divf %150, %151 : vector<2x32xf32>
    %153 = arith.mulf %144, %126 : vector<2x32xf32>
    %154 = arith.mulf %138, %146 : vector<2x32xf32>
    %155 = arith.addf %153, %154 : vector<2x32xf32>
    %156 = math.tanh %155 : vector<2x32xf32>
    %157 = arith.mulf %152, %156 : vector<2x32xf32>
    %c8 = arith.constant 8 : index
    %c0_41 = arith.constant 0 : index
    %158 = vector.load %arg12[%c8, %c0_41] : memref<16x32xf32, #tpu.memory_space<vmem>>, vector<2x32xf32>
    tpu.vector_store %arg12[%c8, %c0_41], %157 {strides = array<i32>} : memref<16x32xf32, #tpu.memory_space<vmem>>, vector<2x32xf32>,
    %159 = vector.extract_strided_slice %7 {offsets = [10, 0], sizes = [2, 128], strides = [1, 1]} : vector<16x128xf32> to vector<2x128xf32>
    %cst_42 = arith.constant dense<0.000000e+00> : vector<2x128xf32>
    %160 = tpu.matmul %157, %9, %cst_42 {dimension_numbers = #tpu.dot_dimension_numbers<[1], [0], [0], [1], [0, 0, 1, 1], [], []>} : vector<2x32xf32>, vector<32x128xf32>, vector<2x128xf32> -> vector<2x128xf32>
    %161 = arith.addf %159, %160 : vector<2x128xf32>
    %162 = vector.extract_strided_slice %161 {offsets = [0, 0], sizes = [2, 32], strides = [1, 1]} : vector<2x128xf32> to vector<2x32xf32>
    %163 = arith.negf %162 : vector<2x32xf32>
    %164 = math.exp %163 : vector<2x32xf32>
    %cst_43 = arith.constant 1.000000e+00 : f32
    %165 = vector.broadcast %cst_43 : f32 to vector<2x32xf32>
    %166 = arith.addf %165, %164 : vector<2x32xf32>
    %167 = arith.divf %165, %166 : vector<2x32xf32>
    %168 = vector.extract_strided_slice %161 {offsets = [0, 32], sizes = [2, 32], strides = [1, 1]} : vector<2x128xf32> to vector<2x32xf32>
    %169 = arith.negf %168 : vector<2x32xf32>
    %170 = math.exp %169 : vector<2x32xf32>
    %cst_44 = arith.constant 1.000000e+00 : f32
    %171 = vector.broadcast %cst_44 : f32 to vector<2x32xf32>
    %172 = arith.addf %171, %170 : vector<2x32xf32>
    %173 = arith.divf %171, %172 : vector<2x32xf32>
    %174 = vector.extract_strided_slice %161 {offsets = [0, 64], sizes = [2, 32], strides = [1, 1]} : vector<2x128xf32> to vector<2x32xf32>
    %175 = math.tanh %174 : vector<2x32xf32>
    %176 = vector.extract_strided_slice %161 {offsets = [0, 96], sizes = [2, 32], strides = [1, 1]} : vector<2x128xf32> to vector<2x32xf32>
    %177 = arith.negf %176 : vector<2x32xf32>
    %178 = math.exp %177 : vector<2x32xf32>
    %cst_45 = arith.constant 1.000000e+00 : f32
    %179 = vector.broadcast %cst_45 : f32 to vector<2x32xf32>
    %180 = arith.addf %179, %178 : vector<2x32xf32>
    %181 = arith.divf %179, %180 : vector<2x32xf32>
    %182 = arith.mulf %173, %155 : vector<2x32xf32>
    %183 = arith.mulf %167, %175 : vector<2x32xf32>
    %184 = arith.addf %182, %183 : vector<2x32xf32>
    %185 = math.tanh %184 : vector<2x32xf32>
    %186 = arith.mulf %181, %185 : vector<2x32xf32>
    %c10 = arith.constant 10 : index
    %c0_46 = arith.constant 0 : index
    %187 = vector.load %arg12[%c10, %c0_46] : memref<16x32xf32, #tpu.memory_space<vmem>>, vector<2x32xf32>
    tpu.vector_store %arg12[%c10, %c0_46], %186 {strides = array<i32>} : memref<16x32xf32, #tpu.memory_space<vmem>>, vector<2x32xf32>,
    %188 = vector.extract_strided_slice %7 {offsets = [12, 0], sizes = [2, 128], strides = [1, 1]} : vector<16x128xf32> to vector<2x128xf32>
    %cst_47 = arith.constant dense<0.000000e+00> : vector<2x128xf32>
    %189 = tpu.matmul %186, %9, %cst_47 {dimension_numbers = #tpu.dot_dimension_numbers<[1], [0], [0], [1], [0, 0, 1, 1], [], []>} : vector<2x32xf32>, vector<32x128xf32>, vector<2x128xf32> -> vector<2x128xf32>
    %190 = arith.addf %188, %189 : vector<2x128xf32>
    %191 = vector.extract_strided_slice %190 {offsets = [0, 0], sizes = [2, 32], strides = [1, 1]} : vector<2x128xf32> to vector<2x32xf32>
    %192 = arith.negf %191 : vector<2x32xf32>
    %193 = math.exp %192 : vector<2x32xf32>
    %cst_48 = arith.constant 1.000000e+00 : f32
    %194 = vector.broadcast %cst_48 : f32 to vector<2x32xf32>
    %195 = arith.addf %194, %193 : vector<2x32xf32>
    %196 = arith.divf %194, %195 : vector<2x32xf32>
    %197 = vector.extract_strided_slice %190 {offsets = [0, 32], sizes = [2, 32], strides = [1, 1]} : vector<2x128xf32> to vector<2x32xf32>
    %198 = arith.negf %197 : vector<2x32xf32>
    %199 = math.exp %198 : vector<2x32xf32>
    %cst_49 = arith.constant 1.000000e+00 : f32
    %200 = vector.broadcast %cst_49 : f32 to vector<2x32xf32>
    %201 = arith.addf %200, %199 : vector<2x32xf32>
    %202 = arith.divf %200, %201 : vector<2x32xf32>
    %203 = vector.extract_strided_slice %190 {offsets = [0, 64], sizes = [2, 32], strides = [1, 1]} : vector<2x128xf32> to vector<2x32xf32>
    %204 = math.tanh %203 : vector<2x32xf32>
    %205 = vector.extract_strided_slice %190 {offsets = [0, 96], sizes = [2, 32], strides = [1, 1]} : vector<2x128xf32> to vector<2x32xf32>
    %206 = arith.negf %205 : vector<2x32xf32>
    %207 = math.exp %206 : vector<2x32xf32>
    %cst_50 = arith.constant 1.000000e+00 : f32
    %208 = vector.broadcast %cst_50 : f32 to vector<2x32xf32>
    %209 = arith.addf %208, %207 : vector<2x32xf32>
    %210 = arith.divf %208, %209 : vector<2x32xf32>
    %211 = arith.mulf %202, %184 : vector<2x32xf32>
    %212 = arith.mulf %196, %204 : vector<2x32xf32>
    %213 = arith.addf %211, %212 : vector<2x32xf32>
    %214 = math.tanh %213 : vector<2x32xf32>
    %215 = arith.mulf %210, %214 : vector<2x32xf32>
    %c12 = arith.constant 12 : index
    %c0_51 = arith.constant 0 : index
    %216 = vector.load %arg12[%c12, %c0_51] : memref<16x32xf32, #tpu.memory_space<vmem>>, vector<2x32xf32>
    tpu.vector_store %arg12[%c12, %c0_51], %215 {strides = array<i32>} : memref<16x32xf32, #tpu.memory_space<vmem>>, vector<2x32xf32>,
    %217 = vector.extract_strided_slice %7 {offsets = [14, 0], sizes = [2, 128], strides = [1, 1]} : vector<16x128xf32> to vector<2x128xf32>
    %cst_52 = arith.constant dense<0.000000e+00> : vector<2x128xf32>
    %218 = tpu.matmul %215, %9, %cst_52 {dimension_numbers = #tpu.dot_dimension_numbers<[1], [0], [0], [1], [0, 0, 1, 1], [], []>} : vector<2x32xf32>, vector<32x128xf32>, vector<2x128xf32> -> vector<2x128xf32>
    %219 = arith.addf %217, %218 : vector<2x128xf32>
    %220 = vector.extract_strided_slice %219 {offsets = [0, 0], sizes = [2, 32], strides = [1, 1]} : vector<2x128xf32> to vector<2x32xf32>
    %221 = arith.negf %220 : vector<2x32xf32>
    %222 = math.exp %221 : vector<2x32xf32>
    %cst_53 = arith.constant 1.000000e+00 : f32
    %223 = vector.broadcast %cst_53 : f32 to vector<2x32xf32>
    %224 = arith.addf %223, %222 : vector<2x32xf32>
    %225 = arith.divf %223, %224 : vector<2x32xf32>
    %226 = vector.extract_strided_slice %219 {offsets = [0, 32], sizes = [2, 32], strides = [1, 1]} : vector<2x128xf32> to vector<2x32xf32>
    %227 = arith.negf %226 : vector<2x32xf32>
    %228 = math.exp %227 : vector<2x32xf32>
    %cst_54 = arith.constant 1.000000e+00 : f32
    %229 = vector.broadcast %cst_54 : f32 to vector<2x32xf32>
    %230 = arith.addf %229, %228 : vector<2x32xf32>
    %231 = arith.divf %229, %230 : vector<2x32xf32>
    %232 = vector.extract_strided_slice %219 {offsets = [0, 64], sizes = [2, 32], strides = [1, 1]} : vector<2x128xf32> to vector<2x32xf32>
    %233 = math.tanh %232 : vector<2x32xf32>
    %234 = vector.extract_strided_slice %219 {offsets = [0, 96], sizes = [2, 32], strides = [1, 1]} : vector<2x128xf32> to vector<2x32xf32>
    %235 = arith.negf %234 : vector<2x32xf32>
    %236 = math.exp %235 : vector<2x32xf32>
    %cst_55 = arith.constant 1.000000e+00 : f32
    %237 = vector.broadcast %cst_55 : f32 to vector<2x32xf32>
    %238 = arith.addf %237, %236 : vector<2x32xf32>
    %239 = arith.divf %237, %238 : vector<2x32xf32>
    %240 = arith.mulf %231, %213 : vector<2x32xf32>
    %241 = arith.mulf %225, %233 : vector<2x32xf32>
    %242 = arith.addf %240, %241 : vector<2x32xf32>
    %243 = math.tanh %242 : vector<2x32xf32>
    %244 = arith.mulf %239, %243 : vector<2x32xf32>
    %c14 = arith.constant 14 : index
    %c0_56 = arith.constant 0 : index
    %245 = vector.load %arg12[%c14, %c0_56] : memref<16x32xf32, #tpu.memory_space<vmem>>, vector<2x32xf32>
    tpu.vector_store %arg12[%c14, %c0_56], %244 {strides = array<i32>} : memref<16x32xf32, #tpu.memory_space<vmem>>, vector<2x32xf32>,
    %c0_57 = arith.constant 0 : index
    %c0_58 = arith.constant 0 : index
    %c0_59 = arith.constant 0 : index
    %246 = vector.load %arg10[%c0_57, %c0_58, %c0_59] : memref<2x2x32xf32, #tpu.memory_space<vmem>>, vector<1x2x32xf32>
    %247 = vector.shape_cast %246 : vector<1x2x32xf32> to vector<2x32xf32>
    %248 = vector.shape_cast %244 : vector<2x32xf32> to vector<1x2x32xf32>
    tpu.vector_store %arg10[%c0_57, %c0_58, %c0_59], %248 {strides = array<i32>} : memref<2x2x32xf32, #tpu.memory_space<vmem>>, vector<1x2x32xf32>,
    %c0_60 = arith.constant 0 : index
    %c0_61 = arith.constant 0 : index
    %c0_62 = arith.constant 0 : index
    %249 = vector.load %arg11[%c0_60, %c0_61, %c0_62] : memref<2x2x32xf32, #tpu.memory_space<vmem>>, vector<1x2x32xf32>
    %250 = vector.shape_cast %249 : vector<1x2x32xf32> to vector<2x32xf32>
    %251 = vector.shape_cast %242 : vector<2x32xf32> to vector<1x2x32xf32>
    tpu.vector_store %arg11[%c0_60, %c0_61, %c0_62], %251 {strides = array<i32>} : memref<2x2x32xf32, #tpu.memory_space<vmem>>, vector<1x2x32xf32>,
    %c0_63 = arith.constant 0 : index
    %c0_64 = arith.constant 0 : index
    %252 = vector.load %arg12[%c0_63, %c0_64] : memref<16x32xf32, #tpu.memory_space<vmem>>, vector<16x32xf32>
    %c1 = arith.constant 1 : index
    %c0_65 = arith.constant 0 : index
    %c0_66 = arith.constant 0 : index
    %253 = vector.load %arg4[%c1, %c0_65, %c0_66] : memref<2x32x128xf32, #tpu.memory_space<vmem>>, vector<1x32x128xf32>
    %254 = vector.shape_cast %253 : vector<1x32x128xf32> to vector<32x128xf32>
    %cst_67 = arith.constant dense<0.000000e+00> : vector<16x128xf32>
    %255 = tpu.matmul %252, %254, %cst_67 {dimension_numbers = #tpu.dot_dimension_numbers<[1], [0], [0], [1], [0, 0, 1, 1], [], []>} : vector<16x32xf32>, vector<32x128xf32>, vector<16x128xf32> -> vector<16x128xf32>
    %c1_68 = arith.constant 1 : index
    %c0_69 = arith.constant 0 : index
    %c0_70 = arith.constant 0 : index
    %256 = vector.load %arg6[%c1_68, %c0_69, %c0_70] : memref<2x1x128xf32, #tpu.memory_space<vmem>>, vector<1x1x128xf32>
    %257 = vector.shape_cast %256 : vector<1x1x128xf32> to vector<1x128xf32>
    %258 = vector.broadcast %257 : vector<1x128xf32> to vector<16x128xf32>
    %259 = arith.addf %255, %258 : vector<16x128xf32>
    %c1_71 = arith.constant 1 : index
    %c0_72 = arith.constant 0 : index
    %c0_73 = arith.constant 0 : index
    %260 = vector.load %arg5[%c1_71, %c0_72, %c0_73] : memref<2x32x128xf32, #tpu.memory_space<vmem>>, vector<1x32x128xf32>
    %261 = vector.shape_cast %260 : vector<1x32x128xf32> to vector<32x128xf32>
    %c1_74 = arith.constant 1 : index
    %c0_75 = arith.constant 0 : index
    %c0_76 = arith.constant 0 : index
    %262 = vector.load %arg2[%c1_74, %c0_75, %c0_76] : memref<2x2x32xf32, #tpu.memory_space<vmem>>, vector<1x2x32xf32>
    %263 = vector.shape_cast %262 : vector<1x2x32xf32> to vector<2x32xf32>
    %c1_77 = arith.constant 1 : index
    %c0_78 = arith.constant 0 : index
    %c0_79 = arith.constant 0 : index
    %264 = vector.load %arg3[%c1_77, %c0_78, %c0_79] : memref<2x2x32xf32, #tpu.memory_space<vmem>>, vector<1x2x32xf32>
    %265 = vector.shape_cast %264 : vector<1x2x32xf32> to vector<2x32xf32>
    %266 = vector.extract_strided_slice %259 {offsets = [0, 0], sizes = [2, 128], strides = [1, 1]} : vector<16x128xf32> to vector<2x128xf32>
    %cst_80 = arith.constant dense<0.000000e+00> : vector<2x128xf32>
    %267 = tpu.matmul %263, %261, %cst_80 {dimension_numbers = #tpu.dot_dimension_numbers<[1], [0], [0], [1], [0, 0, 1, 1], [], []>} : vector<2x32xf32>, vector<32x128xf32>, vector<2x128xf32> -> vector<2x128xf32>
    %268 = arith.addf %266, %267 : vector<2x128xf32>
    %269 = vector.extract_strided_slice %268 {offsets = [0, 0], sizes = [2, 32], strides = [1, 1]} : vector<2x128xf32> to vector<2x32xf32>
    %270 = arith.negf %269 : vector<2x32xf32>
    %271 = math.exp %270 : vector<2x32xf32>
    %cst_81 = arith.constant 1.000000e+00 : f32
    %272 = vector.broadcast %cst_81 : f32 to vector<2x32xf32>
    %273 = arith.addf %272, %271 : vector<2x32xf32>
    %274 = arith.divf %272, %273 : vector<2x32xf32>
    %275 = vector.extract_strided_slice %268 {offsets = [0, 32], sizes = [2, 32], strides = [1, 1]} : vector<2x128xf32> to vector<2x32xf32>
    %276 = arith.negf %275 : vector<2x32xf32>
    %277 = math.exp %276 : vector<2x32xf32>
    %cst_82 = arith.constant 1.000000e+00 : f32
    %278 = vector.broadcast %cst_82 : f32 to vector<2x32xf32>
    %279 = arith.addf %278, %277 : vector<2x32xf32>
    %280 = arith.divf %278, %279 : vector<2x32xf32>
    %281 = vector.extract_strided_slice %268 {offsets = [0, 64], sizes = [2, 32], strides = [1, 1]} : vector<2x128xf32> to vector<2x32xf32>
    %282 = math.tanh %281 : vector<2x32xf32>
    %283 = vector.extract_strided_slice %268 {offsets = [0, 96], sizes = [2, 32], strides = [1, 1]} : vector<2x128xf32> to vector<2x32xf32>
    %284 = arith.negf %283 : vector<2x32xf32>
    %285 = math.exp %284 : vector<2x32xf32>
    %cst_83 = arith.constant 1.000000e+00 : f32
    %286 = vector.broadcast %cst_83 : f32 to vector<2x32xf32>
    %287 = arith.addf %286, %285 : vector<2x32xf32>
    %288 = arith.divf %286, %287 : vector<2x32xf32>
    %289 = arith.mulf %280, %265 : vector<2x32xf32>
    %290 = arith.mulf %274, %282 : vector<2x32xf32>
    %291 = arith.addf %289, %290 : vector<2x32xf32>
    %292 = math.tanh %291 : vector<2x32xf32>
    %293 = arith.mulf %288, %292 : vector<2x32xf32>
    %c0_84 = arith.constant 0 : index
    %c0_85 = arith.constant 0 : index
    %294 = vector.load %arg12[%c0_84, %c0_85] : memref<16x32xf32, #tpu.memory_space<vmem>>, vector<2x32xf32>
    tpu.vector_store %arg12[%c0_84, %c0_85], %293 {strides = array<i32>} : memref<16x32xf32, #tpu.memory_space<vmem>>, vector<2x32xf32>,
    %295 = vector.extract_strided_slice %259 {offsets = [2, 0], sizes = [2, 128], strides = [1, 1]} : vector<16x128xf32> to vector<2x128xf32>
    %cst_86 = arith.constant dense<0.000000e+00> : vector<2x128xf32>
    %296 = tpu.matmul %293, %261, %cst_86 {dimension_numbers = #tpu.dot_dimension_numbers<[1], [0], [0], [1], [0, 0, 1, 1], [], []>} : vector<2x32xf32>, vector<32x128xf32>, vector<2x128xf32> -> vector<2x128xf32>
    %297 = arith.addf %295, %296 : vector<2x128xf32>
    %298 = vector.extract_strided_slice %297 {offsets = [0, 0], sizes = [2, 32], strides = [1, 1]} : vector<2x128xf32> to vector<2x32xf32>
    %299 = arith.negf %298 : vector<2x32xf32>
    %300 = math.exp %299 : vector<2x32xf32>
    %cst_87 = arith.constant 1.000000e+00 : f32
    %301 = vector.broadcast %cst_87 : f32 to vector<2x32xf32>
    %302 = arith.addf %301, %300 : vector<2x32xf32>
    %303 = arith.divf %301, %302 : vector<2x32xf32>
    %304 = vector.extract_strided_slice %297 {offsets = [0, 32], sizes = [2, 32], strides = [1, 1]} : vector<2x128xf32> to vector<2x32xf32>
    %305 = arith.negf %304 : vector<2x32xf32>
    %306 = math.exp %305 : vector<2x32xf32>
    %cst_88 = arith.constant 1.000000e+00 : f32
    %307 = vector.broadcast %cst_88 : f32 to vector<2x32xf32>
    %308 = arith.addf %307, %306 : vector<2x32xf32>
    %309 = arith.divf %307, %308 : vector<2x32xf32>
    %310 = vector.extract_strided_slice %297 {offsets = [0, 64], sizes = [2, 32], strides = [1, 1]} : vector<2x128xf32> to vector<2x32xf32>
    %311 = math.tanh %310 : vector<2x32xf32>
    %312 = vector.extract_strided_slice %297 {offsets = [0, 96], sizes = [2, 32], strides = [1, 1]} : vector<2x128xf32> to vector<2x32xf32>
    %313 = arith.negf %312 : vector<2x32xf32>
    %314 = math.exp %313 : vector<2x32xf32>
    %cst_89 = arith.constant 1.000000e+00 : f32
    %315 = vector.broadcast %cst_89 : f32 to vector<2x32xf32>
    %316 = arith.addf %315, %314 : vector<2x32xf32>
    %317 = arith.divf %315, %316 : vector<2x32xf32>
    %318 = arith.mulf %309, %291 : vector<2x32xf32>
    %319 = arith.mulf %303, %311 : vector<2x32xf32>
    %320 = arith.addf %318, %319 : vector<2x32xf32>
    %321 = math.tanh %320 : vector<2x32xf32>
    %322 = arith.mulf %317, %321 : vector<2x32xf32>
    %c2_90 = arith.constant 2 : index
    %c0_91 = arith.constant 0 : index
    %323 = vector.load %arg12[%c2_90, %c0_91] : memref<16x32xf32, #tpu.memory_space<vmem>>, vector<2x32xf32>
    tpu.vector_store %arg12[%c2_90, %c0_91], %322 {strides = array<i32>} : memref<16x32xf32, #tpu.memory_space<vmem>>, vector<2x32xf32>,
    %324 = vector.extract_strided_slice %259 {offsets = [4, 0], sizes = [2, 128], strides = [1, 1]} : vector<16x128xf32> to vector<2x128xf32>
    %cst_92 = arith.constant dense<0.000000e+00> : vector<2x128xf32>
    %325 = tpu.matmul %322, %261, %cst_92 {dimension_numbers = #tpu.dot_dimension_numbers<[1], [0], [0], [1], [0, 0, 1, 1], [], []>} : vector<2x32xf32>, vector<32x128xf32>, vector<2x128xf32> -> vector<2x128xf32>
    %326 = arith.addf %324, %325 : vector<2x128xf32>
    %327 = vector.extract_strided_slice %326 {offsets = [0, 0], sizes = [2, 32], strides = [1, 1]} : vector<2x128xf32> to vector<2x32xf32>
    %328 = arith.negf %327 : vector<2x32xf32>
    %329 = math.exp %328 : vector<2x32xf32>
    %cst_93 = arith.constant 1.000000e+00 : f32
    %330 = vector.broadcast %cst_93 : f32 to vector<2x32xf32>
    %331 = arith.addf %330, %329 : vector<2x32xf32>
    %332 = arith.divf %330, %331 : vector<2x32xf32>
    %333 = vector.extract_strided_slice %326 {offsets = [0, 32], sizes = [2, 32], strides = [1, 1]} : vector<2x128xf32> to vector<2x32xf32>
    %334 = arith.negf %333 : vector<2x32xf32>
    %335 = math.exp %334 : vector<2x32xf32>
    %cst_94 = arith.constant 1.000000e+00 : f32
    %336 = vector.broadcast %cst_94 : f32 to vector<2x32xf32>
    %337 = arith.addf %336, %335 : vector<2x32xf32>
    %338 = arith.divf %336, %337 : vector<2x32xf32>
    %339 = vector.extract_strided_slice %326 {offsets = [0, 64], sizes = [2, 32], strides = [1, 1]} : vector<2x128xf32> to vector<2x32xf32>
    %340 = math.tanh %339 : vector<2x32xf32>
    %341 = vector.extract_strided_slice %326 {offsets = [0, 96], sizes = [2, 32], strides = [1, 1]} : vector<2x128xf32> to vector<2x32xf32>
    %342 = arith.negf %341 : vector<2x32xf32>
    %343 = math.exp %342 : vector<2x32xf32>
    %cst_95 = arith.constant 1.000000e+00 : f32
    %344 = vector.broadcast %cst_95 : f32 to vector<2x32xf32>
    %345 = arith.addf %344, %343 : vector<2x32xf32>
    %346 = arith.divf %344, %345 : vector<2x32xf32>
    %347 = arith.mulf %338, %320 : vector<2x32xf32>
    %348 = arith.mulf %332, %340 : vector<2x32xf32>
    %349 = arith.addf %347, %348 : vector<2x32xf32>
    %350 = math.tanh %349 : vector<2x32xf32>
    %351 = arith.mulf %346, %350 : vector<2x32xf32>
    %c4_96 = arith.constant 4 : index
    %c0_97 = arith.constant 0 : index
    %352 = vector.load %arg12[%c4_96, %c0_97] : memref<16x32xf32, #tpu.memory_space<vmem>>, vector<2x32xf32>
    tpu.vector_store %arg12[%c4_96, %c0_97], %351 {strides = array<i32>} : memref<16x32xf32, #tpu.memory_space<vmem>>, vector<2x32xf32>,
    %353 = vector.extract_strided_slice %259 {offsets = [6, 0], sizes = [2, 128], strides = [1, 1]} : vector<16x128xf32> to vector<2x128xf32>
    %cst_98 = arith.constant dense<0.000000e+00> : vector<2x128xf32>
    %354 = tpu.matmul %351, %261, %cst_98 {dimension_numbers = #tpu.dot_dimension_numbers<[1], [0], [0], [1], [0, 0, 1, 1], [], []>} : vector<2x32xf32>, vector<32x128xf32>, vector<2x128xf32> -> vector<2x128xf32>
    %355 = arith.addf %353, %354 : vector<2x128xf32>
    %356 = vector.extract_strided_slice %355 {offsets = [0, 0], sizes = [2, 32], strides = [1, 1]} : vector<2x128xf32> to vector<2x32xf32>
    %357 = arith.negf %356 : vector<2x32xf32>
    %358 = math.exp %357 : vector<2x32xf32>
    %cst_99 = arith.constant 1.000000e+00 : f32
    %359 = vector.broadcast %cst_99 : f32 to vector<2x32xf32>
    %360 = arith.addf %359, %358 : vector<2x32xf32>
    %361 = arith.divf %359, %360 : vector<2x32xf32>
    %362 = vector.extract_strided_slice %355 {offsets = [0, 32], sizes = [2, 32], strides = [1, 1]} : vector<2x128xf32> to vector<2x32xf32>
    %363 = arith.negf %362 : vector<2x32xf32>
    %364 = math.exp %363 : vector<2x32xf32>
    %cst_100 = arith.constant 1.000000e+00 : f32
    %365 = vector.broadcast %cst_100 : f32 to vector<2x32xf32>
    %366 = arith.addf %365, %364 : vector<2x32xf32>
    %367 = arith.divf %365, %366 : vector<2x32xf32>
    %368 = vector.extract_strided_slice %355 {offsets = [0, 64], sizes = [2, 32], strides = [1, 1]} : vector<2x128xf32> to vector<2x32xf32>
    %369 = math.tanh %368 : vector<2x32xf32>
    %370 = vector.extract_strided_slice %355 {offsets = [0, 96], sizes = [2, 32], strides = [1, 1]} : vector<2x128xf32> to vector<2x32xf32>
    %371 = arith.negf %370 : vector<2x32xf32>
    %372 = math.exp %371 : vector<2x32xf32>
    %cst_101 = arith.constant 1.000000e+00 : f32
    %373 = vector.broadcast %cst_101 : f32 to vector<2x32xf32>
    %374 = arith.addf %373, %372 : vector<2x32xf32>
    %375 = arith.divf %373, %374 : vector<2x32xf32>
    %376 = arith.mulf %367, %349 : vector<2x32xf32>
    %377 = arith.mulf %361, %369 : vector<2x32xf32>
    %378 = arith.addf %376, %377 : vector<2x32xf32>
    %379 = math.tanh %378 : vector<2x32xf32>
    %380 = arith.mulf %375, %379 : vector<2x32xf32>
    %c6_102 = arith.constant 6 : index
    %c0_103 = arith.constant 0 : index
    %381 = vector.load %arg12[%c6_102, %c0_103] : memref<16x32xf32, #tpu.memory_space<vmem>>, vector<2x32xf32>
    tpu.vector_store %arg12[%c6_102, %c0_103], %380 {strides = array<i32>} : memref<16x32xf32, #tpu.memory_space<vmem>>, vector<2x32xf32>,
    %382 = vector.extract_strided_slice %259 {offsets = [8, 0], sizes = [2, 128], strides = [1, 1]} : vector<16x128xf32> to vector<2x128xf32>
    %cst_104 = arith.constant dense<0.000000e+00> : vector<2x128xf32>
    %383 = tpu.matmul %380, %261, %cst_104 {dimension_numbers = #tpu.dot_dimension_numbers<[1], [0], [0], [1], [0, 0, 1, 1], [], []>} : vector<2x32xf32>, vector<32x128xf32>, vector<2x128xf32> -> vector<2x128xf32>
    %384 = arith.addf %382, %383 : vector<2x128xf32>
    %385 = vector.extract_strided_slice %384 {offsets = [0, 0], sizes = [2, 32], strides = [1, 1]} : vector<2x128xf32> to vector<2x32xf32>
    %386 = arith.negf %385 : vector<2x32xf32>
    %387 = math.exp %386 : vector<2x32xf32>
    %cst_105 = arith.constant 1.000000e+00 : f32
    %388 = vector.broadcast %cst_105 : f32 to vector<2x32xf32>
    %389 = arith.addf %388, %387 : vector<2x32xf32>
    %390 = arith.divf %388, %389 : vector<2x32xf32>
    %391 = vector.extract_strided_slice %384 {offsets = [0, 32], sizes = [2, 32], strides = [1, 1]} : vector<2x128xf32> to vector<2x32xf32>
    %392 = arith.negf %391 : vector<2x32xf32>
    %393 = math.exp %392 : vector<2x32xf32>
    %cst_106 = arith.constant 1.000000e+00 : f32
    %394 = vector.broadcast %cst_106 : f32 to vector<2x32xf32>
    %395 = arith.addf %394, %393 : vector<2x32xf32>
    %396 = arith.divf %394, %395 : vector<2x32xf32>
    %397 = vector.extract_strided_slice %384 {offsets = [0, 64], sizes = [2, 32], strides = [1, 1]} : vector<2x128xf32> to vector<2x32xf32>
    %398 = math.tanh %397 : vector<2x32xf32>
    %399 = vector.extract_strided_slice %384 {offsets = [0, 96], sizes = [2, 32], strides = [1, 1]} : vector<2x128xf32> to vector<2x32xf32>
    %400 = arith.negf %399 : vector<2x32xf32>
    %401 = math.exp %400 : vector<2x32xf32>
    %cst_107 = arith.constant 1.000000e+00 : f32
    %402 = vector.broadcast %cst_107 : f32 to vector<2x32xf32>
    %403 = arith.addf %402, %401 : vector<2x32xf32>
    %404 = arith.divf %402, %403 : vector<2x32xf32>
    %405 = arith.mulf %396, %378 : vector<2x32xf32>
    %406 = arith.mulf %390, %398 : vector<2x32xf32>
    %407 = arith.addf %405, %406 : vector<2x32xf32>
    %408 = math.tanh %407 : vector<2x32xf32>
    %409 = arith.mulf %404, %408 : vector<2x32xf32>
    %c8_108 = arith.constant 8 : index
    %c0_109 = arith.constant 0 : index
    %410 = vector.load %arg12[%c8_108, %c0_109] : memref<16x32xf32, #tpu.memory_space<vmem>>, vector<2x32xf32>
    tpu.vector_store %arg12[%c8_108, %c0_109], %409 {strides = array<i32>} : memref<16x32xf32, #tpu.memory_space<vmem>>, vector<2x32xf32>,
    %411 = vector.extract_strided_slice %259 {offsets = [10, 0], sizes = [2, 128], strides = [1, 1]} : vector<16x128xf32> to vector<2x128xf32>
    %cst_110 = arith.constant dense<0.000000e+00> : vector<2x128xf32>
    %412 = tpu.matmul %409, %261, %cst_110 {dimension_numbers = #tpu.dot_dimension_numbers<[1], [0], [0], [1], [0, 0, 1, 1], [], []>} : vector<2x32xf32>, vector<32x128xf32>, vector<2x128xf32> -> vector<2x128xf32>
    %413 = arith.addf %411, %412 : vector<2x128xf32>
    %414 = vector.extract_strided_slice %413 {offsets = [0, 0], sizes = [2, 32], strides = [1, 1]} : vector<2x128xf32> to vector<2x32xf32>
    %415 = arith.negf %414 : vector<2x32xf32>
    %416 = math.exp %415 : vector<2x32xf32>
    %cst_111 = arith.constant 1.000000e+00 : f32
    %417 = vector.broadcast %cst_111 : f32 to vector<2x32xf32>
    %418 = arith.addf %417, %416 : vector<2x32xf32>
    %419 = arith.divf %417, %418 : vector<2x32xf32>
    %420 = vector.extract_strided_slice %413 {offsets = [0, 32], sizes = [2, 32], strides = [1, 1]} : vector<2x128xf32> to vector<2x32xf32>
    %421 = arith.negf %420 : vector<2x32xf32>
    %422 = math.exp %421 : vector<2x32xf32>
    %cst_112 = arith.constant 1.000000e+00 : f32
    %423 = vector.broadcast %cst_112 : f32 to vector<2x32xf32>
    %424 = arith.addf %423, %422 : vector<2x32xf32>
    %425 = arith.divf %423, %424 : vector<2x32xf32>
    %426 = vector.extract_strided_slice %413 {offsets = [0, 64], sizes = [2, 32], strides = [1, 1]} : vector<2x128xf32> to vector<2x32xf32>
    %427 = math.tanh %426 : vector<2x32xf32>
    %428 = vector.extract_strided_slice %413 {offsets = [0, 96], sizes = [2, 32], strides = [1, 1]} : vector<2x128xf32> to vector<2x32xf32>
    %429 = arith.negf %428 : vector<2x32xf32>
    %430 = math.exp %429 : vector<2x32xf32>
    %cst_113 = arith.constant 1.000000e+00 : f32
    %431 = vector.broadcast %cst_113 : f32 to vector<2x32xf32>
    %432 = arith.addf %431, %430 : vector<2x32xf32>
    %433 = arith.divf %431, %432 : vector<2x32xf32>
    %434 = arith.mulf %425, %407 : vector<2x32xf32>
    %435 = arith.mulf %419, %427 : vector<2x32xf32>
    %436 = arith.addf %434, %435 : vector<2x32xf32>
    %437 = math.tanh %436 : vector<2x32xf32>
    %438 = arith.mulf %433, %437 : vector<2x32xf32>
    %c10_114 = arith.constant 10 : index
    %c0_115 = arith.constant 0 : index
    %439 = vector.load %arg12[%c10_114, %c0_115] : memref<16x32xf32, #tpu.memory_space<vmem>>, vector<2x32xf32>
    tpu.vector_store %arg12[%c10_114, %c0_115], %438 {strides = array<i32>} : memref<16x32xf32, #tpu.memory_space<vmem>>, vector<2x32xf32>,
    %440 = vector.extract_strided_slice %259 {offsets = [12, 0], sizes = [2, 128], strides = [1, 1]} : vector<16x128xf32> to vector<2x128xf32>
    %cst_116 = arith.constant dense<0.000000e+00> : vector<2x128xf32>
    %441 = tpu.matmul %438, %261, %cst_116 {dimension_numbers = #tpu.dot_dimension_numbers<[1], [0], [0], [1], [0, 0, 1, 1], [], []>} : vector<2x32xf32>, vector<32x128xf32>, vector<2x128xf32> -> vector<2x128xf32>
    %442 = arith.addf %440, %441 : vector<2x128xf32>
    %443 = vector.extract_strided_slice %442 {offsets = [0, 0], sizes = [2, 32], strides = [1, 1]} : vector<2x128xf32> to vector<2x32xf32>
    %444 = arith.negf %443 : vector<2x32xf32>
    %445 = math.exp %444 : vector<2x32xf32>
    %cst_117 = arith.constant 1.000000e+00 : f32
    %446 = vector.broadcast %cst_117 : f32 to vector<2x32xf32>
    %447 = arith.addf %446, %445 : vector<2x32xf32>
    %448 = arith.divf %446, %447 : vector<2x32xf32>
    %449 = vector.extract_strided_slice %442 {offsets = [0, 32], sizes = [2, 32], strides = [1, 1]} : vector<2x128xf32> to vector<2x32xf32>
    %450 = arith.negf %449 : vector<2x32xf32>
    %451 = math.exp %450 : vector<2x32xf32>
    %cst_118 = arith.constant 1.000000e+00 : f32
    %452 = vector.broadcast %cst_118 : f32 to vector<2x32xf32>
    %453 = arith.addf %452, %451 : vector<2x32xf32>
    %454 = arith.divf %452, %453 : vector<2x32xf32>
    %455 = vector.extract_strided_slice %442 {offsets = [0, 64], sizes = [2, 32], strides = [1, 1]} : vector<2x128xf32> to vector<2x32xf32>
    %456 = math.tanh %455 : vector<2x32xf32>
    %457 = vector.extract_strided_slice %442 {offsets = [0, 96], sizes = [2, 32], strides = [1, 1]} : vector<2x128xf32> to vector<2x32xf32>
    %458 = arith.negf %457 : vector<2x32xf32>
    %459 = math.exp %458 : vector<2x32xf32>
    %cst_119 = arith.constant 1.000000e+00 : f32
    %460 = vector.broadcast %cst_119 : f32 to vector<2x32xf32>
    %461 = arith.addf %460, %459 : vector<2x32xf32>
    %462 = arith.divf %460, %461 : vector<2x32xf32>
    %463 = arith.mulf %454, %436 : vector<2x32xf32>
    %464 = arith.mulf %448, %456 : vector<2x32xf32>
    %465 = arith.addf %463, %464 : vector<2x32xf32>
    %466 = math.tanh %465 : vector<2x32xf32>
    %467 = arith.mulf %462, %466 : vector<2x32xf32>
    %c12_120 = arith.constant 12 : index
    %c0_121 = arith.constant 0 : index
    %468 = vector.load %arg12[%c12_120, %c0_121] : memref<16x32xf32, #tpu.memory_space<vmem>>, vector<2x32xf32>
    tpu.vector_store %arg12[%c12_120, %c0_121], %467 {strides = array<i32>} : memref<16x32xf32, #tpu.memory_space<vmem>>, vector<2x32xf32>,
    %469 = vector.extract_strided_slice %259 {offsets = [14, 0], sizes = [2, 128], strides = [1, 1]} : vector<16x128xf32> to vector<2x128xf32>
    %cst_122 = arith.constant dense<0.000000e+00> : vector<2x128xf32>
    %470 = tpu.matmul %467, %261, %cst_122 {dimension_numbers = #tpu.dot_dimension_numbers<[1], [0], [0], [1], [0, 0, 1, 1], [], []>} : vector<2x32xf32>, vector<32x128xf32>, vector<2x128xf32> -> vector<2x128xf32>
    %471 = arith.addf %469, %470 : vector<2x128xf32>
    %472 = vector.extract_strided_slice %471 {offsets = [0, 0], sizes = [2, 32], strides = [1, 1]} : vector<2x128xf32> to vector<2x32xf32>
    %473 = arith.negf %472 : vector<2x32xf32>
    %474 = math.exp %473 : vector<2x32xf32>
    %cst_123 = arith.constant 1.000000e+00 : f32
    %475 = vector.broadcast %cst_123 : f32 to vector<2x32xf32>
    %476 = arith.addf %475, %474 : vector<2x32xf32>
    %477 = arith.divf %475, %476 : vector<2x32xf32>
    %478 = vector.extract_strided_slice %471 {offsets = [0, 32], sizes = [2, 32], strides = [1, 1]} : vector<2x128xf32> to vector<2x32xf32>
    %479 = arith.negf %478 : vector<2x32xf32>
    %480 = math.exp %479 : vector<2x32xf32>
    %cst_124 = arith.constant 1.000000e+00 : f32
    %481 = vector.broadcast %cst_124 : f32 to vector<2x32xf32>
    %482 = arith.addf %481, %480 : vector<2x32xf32>
    %483 = arith.divf %481, %482 : vector<2x32xf32>
    %484 = vector.extract_strided_slice %471 {offsets = [0, 64], sizes = [2, 32], strides = [1, 1]} : vector<2x128xf32> to vector<2x32xf32>
    %485 = math.tanh %484 : vector<2x32xf32>
    %486 = vector.extract_strided_slice %471 {offsets = [0, 96], sizes = [2, 32], strides = [1, 1]} : vector<2x128xf32> to vector<2x32xf32>
    %487 = arith.negf %486 : vector<2x32xf32>
    %488 = math.exp %487 : vector<2x32xf32>
    %cst_125 = arith.constant 1.000000e+00 : f32
    %489 = vector.broadcast %cst_125 : f32 to vector<2x32xf32>
    %490 = arith.addf %489, %488 : vector<2x32xf32>
    %491 = arith.divf %489, %490 : vector<2x32xf32>
    %492 = arith.mulf %483, %465 : vector<2x32xf32>
    %493 = arith.mulf %477, %485 : vector<2x32xf32>
    %494 = arith.addf %492, %493 : vector<2x32xf32>
    %495 = math.tanh %494 : vector<2x32xf32>
    %496 = arith.mulf %491, %495 : vector<2x32xf32>
    %c14_126 = arith.constant 14 : index
    %c0_127 = arith.constant 0 : index
    %497 = vector.load %arg12[%c14_126, %c0_127] : memref<16x32xf32, #tpu.memory_space<vmem>>, vector<2x32xf32>
    tpu.vector_store %arg12[%c14_126, %c0_127], %496 {strides = array<i32>} : memref<16x32xf32, #tpu.memory_space<vmem>>, vector<2x32xf32>,
    %c1_128 = arith.constant 1 : index
    %c0_129 = arith.constant 0 : index
    %c0_130 = arith.constant 0 : index
    %498 = vector.load %arg10[%c1_128, %c0_129, %c0_130] : memref<2x2x32xf32, #tpu.memory_space<vmem>>, vector<1x2x32xf32>
    %499 = vector.shape_cast %498 : vector<1x2x32xf32> to vector<2x32xf32>
    %500 = vector.shape_cast %496 : vector<2x32xf32> to vector<1x2x32xf32>
    tpu.vector_store %arg10[%c1_128, %c0_129, %c0_130], %500 {strides = array<i32>} : memref<2x2x32xf32, #tpu.memory_space<vmem>>, vector<1x2x32xf32>,
    %c1_131 = arith.constant 1 : index
    %c0_132 = arith.constant 0 : index
    %c0_133 = arith.constant 0 : index
    %501 = vector.load %arg11[%c1_131, %c0_132, %c0_133] : memref<2x2x32xf32, #tpu.memory_space<vmem>>, vector<1x2x32xf32>
    %502 = vector.shape_cast %501 : vector<1x2x32xf32> to vector<2x32xf32>
    %503 = vector.shape_cast %494 : vector<2x32xf32> to vector<1x2x32xf32>
    tpu.vector_store %arg11[%c1_131, %c0_132, %c0_133], %503 {strides = array<i32>} : memref<2x2x32xf32, #tpu.memory_space<vmem>>, vector<1x2x32xf32>,
    %c0_134 = arith.constant 0 : index
    %c0_135 = arith.constant 0 : index
    %504 = vector.load %arg12[%c0_134, %c0_135] : memref<16x32xf32, #tpu.memory_space<vmem>>, vector<16x32xf32>
    %c0_136 = arith.constant 0 : index
    %c0_137 = arith.constant 0 : index
    %505 = vector.load %arg7[%c0_136, %c0_137] : memref<32x128xf32, #tpu.memory_space<vmem>>, vector<32x128xf32>
    %cst_138 = arith.constant dense<0.000000e+00> : vector<16x128xf32>
    %506 = tpu.matmul %504, %505, %cst_138 {dimension_numbers = #tpu.dot_dimension_numbers<[1], [0], [0], [1], [0, 0, 1, 1], [], []>} : vector<16x32xf32>, vector<32x128xf32>, vector<16x128xf32> -> vector<16x128xf32>
    %c0_139 = arith.constant 0 : index
    %c0_140 = arith.constant 0 : index
    %507 = vector.load %arg8[%c0_139, %c0_140] : memref<1x128xf32, #tpu.memory_space<vmem>>, vector<1x128xf32>
    %508 = vector.broadcast %507 : vector<1x128xf32> to vector<16x128xf32>
    %509 = arith.addf %506, %508 : vector<16x128xf32>
    %cst_141 = arith.constant dense<0xFF800000> : vector<16xf32>
    %510 = vector.multi_reduction <maximumf>, %509, %cst_141 [1] : vector<16x128xf32> to vector<16xf32>
    %511 = vector.shape_cast %510 : vector<16xf32> to vector<16x1xf32>
    %512 = vector.broadcast %511 : vector<16x1xf32> to vector<16x128xf32>
    %513 = arith.subf %509, %512 : vector<16x128xf32>
    %514 = math.exp %513 : vector<16x128xf32>
    %cst_142 = arith.constant dense<0.000000e+00> : vector<16xf32>
    %515 = vector.multi_reduction <add>, %514, %cst_142 [1] : vector<16x128xf32> to vector<16xf32>
    %516 = vector.shape_cast %515 : vector<16xf32> to vector<16x1xf32>
    %517 = math.log %516 : vector<16x1xf32>
    %518 = vector.broadcast %517 : vector<16x1xf32> to vector<16x128xf32>
    %519 = arith.subf %513, %518 : vector<16x128xf32>
    %c0_143 = arith.constant 0 : index
    %c0_144 = arith.constant 0 : index
    %520 = vector.load %arg9[%c0_143, %c0_144] : memref<16x128xf32, #tpu.memory_space<vmem>>, vector<16x128xf32>
    tpu.vector_store %arg9[%c0_143, %c0_144], %519 {strides = array<i32>} : memref<16x128xf32, #tpu.memory_space<vmem>>, vector<16x128xf32>,
    return
  }
  func.func @transform_0(%arg0: i32) -> (i32, i32) {
    %c0_i32 = arith.constant 0 : i32
    %c0_i32_0 = arith.constant 0 : i32
    %c0_i32_1 = arith.constant 0 : i32
    return %c0_i32, %c0_i32_0 : i32, i32
  }
  func.func @transform_1(%arg0: i32) -> (i32, i32, i32) {
    %c0_i32 = arith.constant 0 : i32
    %c0_i32_0 = arith.constant 0 : i32
    %c0_i32_1 = arith.constant 0 : i32
    %c0_i32_2 = arith.constant 0 : i32
    return %c0_i32, %c0_i32_0, %c0_i32_1 : i32, i32, i32
  }
  func.func @transform_2(%arg0: i32) -> (i32, i32, i32) {
    %c0_i32 = arith.constant 0 : i32
    %c0_i32_0 = arith.constant 0 : i32
    %c0_i32_1 = arith.constant 0 : i32
    %c0_i32_2 = arith.constant 0 : i32
    return %c0_i32, %c0_i32_0, %c0_i32_1 : i32, i32, i32
  }
  func.func @transform_3(%arg0: i32) -> (i32, i32, i32) {
    %c0_i32 = arith.constant 0 : i32
    %c0_i32_0 = arith.constant 0 : i32
    %c0_i32_1 = arith.constant 0 : i32
    %c0_i32_2 = arith.constant 0 : i32
    return %c0_i32, %c0_i32_0, %c0_i32_1 : i32, i32, i32
  }
  func.func @transform_4(%arg0: i32) -> (i32, i32, i32) {
    %c0_i32 = arith.constant 0 : i32
    %c0_i32_0 = arith.constant 0 : i32
    %c0_i32_1 = arith.constant 0 : i32
    %c0_i32_2 = arith.constant 0 : i32
    return %c0_i32, %c0_i32_0, %c0_i32_1 : i32, i32, i32
  }
  func.func @transform_5(%arg0: i32) -> (i32, i32, i32) {
    %c0_i32 = arith.constant 0 : i32
    %c0_i32_0 = arith.constant 0 : i32
    %c0_i32_1 = arith.constant 0 : i32
    %c0_i32_2 = arith.constant 0 : i32
    return %c0_i32, %c0_i32_0, %c0_i32_1 : i32, i32, i32
  }
  func.func @transform_6(%arg0: i32) -> (i32, i32) {
    %c0_i32 = arith.constant 0 : i32
    %c0_i32_0 = arith.constant 0 : i32
    %c0_i32_1 = arith.constant 0 : i32
    return %c0_i32, %c0_i32_0 : i32, i32
  }
  func.func @transform_7(%arg0: i32) -> (i32, i32) {
    %c0_i32 = arith.constant 0 : i32
    %c0_i32_0 = arith.constant 0 : i32
    %c0_i32_1 = arith.constant 0 : i32
    return %c0_i32, %c0_i32_0 : i32, i32
  }
  func.func @transform_8(%arg0: i32) -> (i32, i32) {
    %c0_i32 = arith.constant 0 : i32
    %c0_i32_0 = arith.constant 0 : i32
    %c0_i32_1 = arith.constant 0 : i32
    return %c0_i32, %c0_i32_0 : i32, i32
  }
  func.func @transform_9(%arg0: i32) -> (i32, i32, i32) {
    %c0_i32 = arith.constant 0 : i32
    %c0_i32_0 = arith.constant 0 : i32
    %c0_i32_1 = arith.constant 0 : i32
    %c0_i32_2 = arith.constant 0 : i32
    return %c0_i32, %c0_i32_0, %c0_i32_1 : i32, i32, i32
  }
  func.func @transform_10(%arg0: i32) -> (i32, i32, i32) {
    %c0_i32 = arith.constant 0 : i32
    %c0_i32_0 = arith.constant 0 : i32
    %c0_i32_1 = arith.constant 0 : i32
    %c0_i32_2 = arith.constant 0 : i32
    return %c0_i32, %c0_i32_0, %c0_i32_1 : i32, i32, i32
  }
}

</mosaic_0001>

<bundles_post_ra>
// kernel: tpu_custom_call.1
= control target key start
LH: loop header
LB: loop body
LE: loop exit
PB: predicated region body
PF: predicated region fallthrough
CT: control target
= control target key end

     0   :  { %16 = vsyncpa [#allocation4], 0  ;;  %s3540_s0 = inlined_call_operand.hbm [shape: f32[16,32], index: 0, kind: input, shape index: {}]   ;;  %s3541_s1 = inlined_call_operand.hbm [shape: f32[2,2,32], index: 1, kind: input, shape index: {}]   ;;  %s3542_s2 = inlined_call_operand.vmem [shape: f32[2,2,32], index: 2, kind: input, shape index: {}]   ;;  %s3543_s3 = inlined_call_operand.hbm [shape: f32[2,32,128], index: 3, kind: input, shape index: {}]   ;;  %s3544_s4 = inlined_call_operand.hbm [shape: f32[2,32,128], index: 4, kind: input, shape index: {}]   ;;  %s3545_s5 = inlined_call_operand.vmem [shape: f32[2,1,128], index: 5, kind: input, shape index: {}]   ;;  %s3546_s6 = inlined_call_operand.hbm [shape: f32[32,128], index: 6, kind: input, shape index: {}]   ;;  %s3547_s7 = inlined_call_operand.vmem [shape: f32[1,128], index: 7, kind: input, shape index: {}]   ;;  %s3548_s8 = inlined_call_operand.hbm [shape: f32[16,128], index: 8, kind: output, shape index: {0}]   ;;  %s3549_s9 = inlined_call_operand.hbm [shape: f32[2,2,32], index: 9, kind: output, shape index: {1}]   ;;  %s3550_s10 = inlined_call_operand.hbm [shape: f32[2,2,32], index: 10, kind: output, shape index: {2}]  }
   0x1   :  { %17 = vsyncpa [#allocation7], 0 }
   0x2   :  { %18 = vsyncpa [#allocation10], 0 }
   0x3   :  { %19 = vsyncpa [#allocation5], 0 }
   0x4   :  { %20 = vsyncpa [#allocation14], 0  ;;  %s3051_s13 = smov [#allocation6]   ;;  %s2865_s17 = scalar_lea.hbm %s3541_s1, 64 }
   0x5   :  { %s38_s14 = sshll.u32 %s3051_s13, 4  ;;  %p2866_p0 = scmp.ne.s32.totalorder %s3541_s1, %s2865_s17  ;;  %s39_s14 = int_to_ptr.vmem [resolvable:$true] %s38_s14 }
   0x6   :  { %p2869_p1 = scmp.lt.u32.totalorder %s2865_s17, %s3541_s1 }
   0x8   :  { %p2871_p2 = pnand %p2869_p1, %p2866_p0 }
   0xa   :  { %2874 = shalt.err (!%p2871_p2)
}
   0xb   :  { %s2875_s22 = scalar_lea.vmem %s39_s14, 64  ;;  %p2880_p4 = scmp.lt.s32.totalorder %s39_s14, %s39_s14 }
   0xc   :  { %p2876_p3 = scmp.ne.s32.totalorder %s39_s14, %s2875_s22  ;;  %p2881_p5 = scmp.lt.s32.totalorder %s2875_s22, %s2875_s22 }
   0xe   :  { %p2882_p6 = por %p2881_p5, %p2880_p4 }
  0x10   :  { %p2883_p7 = pnand %p2882_p6, %p2876_p3 }
  0x12   :  { %2886 = shalt.err (!%p2883_p7)
}
  0x13   :  { %s3052_s23 = smov 32   ;;  %s3053_s24 = smov 2  }
  0x14   :  { %44 = dma.hbm_to_vmem [thread:$0]  %s3541_s1, 64, %s39_s14, [#allocation7], %s3052_s23, %s3052_s23, %s3053_s24  }
  0x15   :  { %s3054_s27 = smov [#allocation9]   ;;  %s3055_s29 = smov [#allocation3]  }
  0x16   :  { %s64_s28 = sshll.u32 %s3054_s27, 4  ;;  %s26_s30 = sshll.u32 %s3055_s29, 4  ;;  %s65_s28 = int_to_ptr.vmem [resolvable:$true] %s64_s28  ;;  %s27_s30 = int_to_ptr.vmem [resolvable:$true] %s26_s30 }
  0x17   :  { %s2887_s13 = scalar_lea.hbm %s3544_s4, 1024 }
  0x18   :  { %p2888_p8 = scmp.ne.s32.totalorder %s3544_s4, %s2887_s13  ;;  %p2891_p9 = scmp.lt.u32.totalorder %s2887_s13, %s3544_s4 }
  0x1a   :  { %p2893_p10 = pnand %p2891_p9, %p2888_p8 }
  0x1c   :  { %2896 = shalt.err (!%p2893_p10)
}
  0x1d   :  { %s2897_s1 = scalar_lea.vmem %s65_s28, 1024  ;;  %p2902_p12 = scmp.lt.s32.totalorder %s65_s28, %s65_s28 }
  0x1e   :  { %p2898_p11 = scmp.ne.s32.totalorder %s65_s28, %s2897_s1  ;;  %p2903_p13 = scmp.lt.s32.totalorder %s2897_s1, %s2897_s1 }
  0x20   :  { %p2904_p0 = por %p2903_p13, %p2902_p12 }
  0x22   :  { %p2905_p1 = pnand %p2904_p0, %p2898_p11 }
  0x24   :  { %2908 = shalt.err (!%p2905_p1)
}
  0x25   :  { %s3056_s14 = smov 128   ;;  %s3057_s19 = smov 8  }
  0x26   :  { %70 = dma.hbm_to_vmem [thread:$0]  %s3544_s4, 1024, %s65_s28, [#allocation10], %s3056_s14, %s3056_s14, %s3057_s19  }
  0x27   :  { %s2909_s26 = scalar_lea.hbm %s3540_s0, 256 }
  0x28   :  { %p2910_p2 = scmp.ne.s32.totalorder %s3540_s0, %s2909_s26  ;;  %p2913_p3 = scmp.lt.u32.totalorder %s2909_s26, %s3540_s0 }
  0x2a   :  { %p2915_p4 = pnand %p2913_p3, %p2910_p2 }
  0x2c   :  { %2918 = shalt.err (!%p2915_p4)
}
  0x2d   :  { %s2919_s13 = scalar_lea.vmem %s27_s30, 256  ;;  %p2924_p6 = scmp.lt.s32.totalorder %s27_s30, %s27_s30 }
  0x2e   :  { %p2920_p5 = scmp.ne.s32.totalorder %s27_s30, %s2919_s13  ;;  %p2925_p7 = scmp.lt.s32.totalorder %s2919_s13, %s2919_s13 }
  0x30   :  { %p2926_p8 = por %p2925_p7, %p2924_p6 }
  0x32   :  { %p2927_p9 = pnand %p2926_p8, %p2920_p5 }
  0x34   :  { %2930 = shalt.err (!%p2927_p9)
}
  0x35   :  { %32 = dma.hbm_to_vmem [thread:$0]  %s3540_s0, 256, %s27_s30, [#allocation4], %s3056_s14, %s3056_s14, %s3057_s19  }
  0x36   :  { %s3058_s15 = smov [#allocation8]   ;;  %s3059_s17 = smov [#allocation11]  }
  0x37   :  { %s52_s16 = sshll.u32 %s3058_s15, 4  ;;  %s78_s18 = sshll.u32 %s3059_s17, 4  ;;  %s53_s16 = int_to_ptr.vmem [resolvable:$true] %s52_s16  ;;  %s79_s18 = int_to_ptr.vmem [resolvable:$true] %s78_s18 }
  0x38   :  { %s2931_s21 = scalar_lea.hbm %s3543_s3, 1024 }
  0x39   :  { %p2932_p10 = scmp.ne.s32.totalorder %s3543_s3, %s2931_s21  ;;  %p2935_p11 = scmp.lt.u32.totalorder %s2931_s21, %s3543_s3 }
  0x3b   :  { %p2937_p12 = pnand %p2935_p11, %p2932_p10 }
  0x3d   :  { %2940 = shalt.err (!%p2937_p12)
}
  0x3e   :  { %s2941_s0 = scalar_lea.vmem %s53_s16, 1024  ;;  %p2946_p0 = scmp.lt.s32.totalorder %s53_s16, %s53_s16 }
  0x3f   :  { %p2942_p13 = scmp.ne.s32.totalorder %s53_s16, %s2941_s0  ;;  %p2947_p1 = scmp.lt.s32.totalorder %s2941_s0, %s2941_s0 }
  0x41   :  { %p2948_p2 = por %p2947_p1, %p2946_p0 }
  0x43   :  { %p2949_p3 = pnand %p2948_p2, %p2942_p13 }
  0x45   :  { %2952 = shalt.err (!%p2949_p3)
}
  0x46   :  { %58 = dma.hbm_to_vmem [thread:$0]  %s3543_s3, 1024, %s53_s16, [#allocation7], %s3056_s14, %s3056_s14, %s3057_s19  }
  0x47   :  { %s2953_s13 = scalar_lea.hbm %s3546_s6, 512 }
  0x48   :  { %p2954_p4 = scmp.ne.s32.totalorder %s3546_s6, %s2953_s13  ;;  %p2957_p5 = scmp.lt.u32.totalorder %s2953_s13, %s3546_s6 }
  0x4a   :  { %p2959_p6 = pnand %p2957_p5, %p2954_p4 }
  0x4c   :  { %2962 = shalt.err (!%p2959_p6)
}
  0x4d   :  { %s2963_s1 = scalar_lea.vmem %s79_s18, 512  ;;  %p2968_p8 = scmp.lt.s32.totalorder %s79_s18, %s79_s18 }
  0x4e   :  { %p2964_p7 = scmp.ne.s32.totalorder %s79_s18, %s2963_s1  ;;  %p2969_p9 = scmp.lt.s32.totalorder %s2963_s1, %s2963_s1 }
  0x50   :  { %p2970_p10 = por %p2969_p9, %p2968_p8 }
  0x52   :  { %p2971_p11 = pnand %p2970_p10, %p2964_p7 }
  0x54   :  { %2974 = shalt.err (!%p2971_p11)
}
  0x55   :  { %84 = dma.hbm_to_vmem [thread:$0]  %s3546_s6, 512, %s79_s18, [#allocation10], %s3056_s14, %s3056_s14, %s3057_s19  }
  0x56   :  { %3041 = dma.done.wait [#allocation4], 256  }
  0x57   :  { %3042 = vsyncadd [#allocation4], 4294967040 }
  0x58   :  { %3043 = dma.done.wait [#allocation7], 1088  }
  0x59   :  { %3044 = vsyncadd [#allocation7], 4294966208 }
  0x5a   :  { %3045 = dma.done.wait [#allocation10], 1536  }
  0x5b   :  { %3046 = vsyncadd [#allocation10], 4294965760  ;;  %v3060_v0 = vmov 0.0|0.0   ;;  %vm3061_vm0 = vmmov 0   ;;  %v3062_v1 = vmov 0.0   ;;  %v104_v2 = vld [vmem:[#allocation8] sm:$0xff] }
  0x5c   :  { %2600 = vmatprep.subr.bf16.mxu1 %v3060_v0  ;;  %2402 = vmatprep.mubr.msk.f32.mxu1 %vm3061_vm0, %v3062_v1  ;;  %v105_v3 = vld [vmem:[#allocation8 + $0x8] sm:$0xff]  ;;  %v197_v4 = vld [vmem:[#allocation9] sm:$0xff]  ;;  %vm115_vm1 = vcmask 261120   ;;  %v106_v7 = vld [vmem:[#allocation8 + $0x10] sm:$0xff]  ;;  %s3063_s20 = smov 64   ;;  %vm309_vm2 = vcmask 254976  }
  0x5d   :  { %v2592_v5 = vpack.c.bf16 %v105_v3, %v104_v2  ;;  %v198_v6 = vld [vmem:[#allocation9 + $0x8] sm:$0xff]  ;;  %v107_v8 = vld [vmem:[#allocation8 + $0x18] sm:$0xff]  ;;  %v199_v12 = vld [vmem:[#allocation9 + $0x10] sm:$0xff]  ;;  %vm418_vm3 = vcmask 257026   ;;  %vm642_vm4 = vcmask 261126   ;;  %vm530_vm5 = vcmask 259076  }
  0x5e   :  { %v3201_v9 = vpack.c.bf16 %v198_v6, %v197_v4  ;;  %v2596_v10 = vpack.c.bf16 %v107_v8, %v106_v7  ;;  %v102_v11 = vld [vmem:[#allocation3] sm:$0xff]  ;;  %v200_v13 = vld [vmem:[#allocation9 + $0x18] sm:$0xff]  ;;  %s3064_s30 = smov 96  }
  0x5f   :  { %2593 = vmatprep.subr.bf16.mxu0 %v2592_v5  ;;  %2391 = vmatprep.mubr.msk.f32.mxu0 %vm115_vm1, %v102_v11  ;;  %v3205_v14 = vpack.c.bf16 %v200_v13, %v199_v12  ;;  %v103_v15 = vld [vmem:[#allocation3 + $0x8] sm:$0xff]  ;;  %v201_v16 = vld [vmem:[#allocation6] sm:$0x3] }
  0x60   :  { %2595 = vmatpush3.bf16.msra.mxu0 %v2592_v5  ;;  %2602 = vmatpush3.bf16.msra.mxu1 %v3201_v9  ;;  %v2242_v17 = vld [vmem:[%s3545_s5] ss:$0 sm:$0xff] }
  0x61   :  { %2597 = vmatprep.subr.bf16.mxu0 %v2596_v10  ;;  %2603 = vmatprep.subr.bf16.mxu1 %v3060_v0  ;;  %v202_v26 = vld [vmem:[%s3542_s2] sm:$0x3] }
  0x64   :  { %2599 = vmatpush3.bf16.msra.mxu0 %v2596_v10  ;;  %2605 = vmatpush3.bf16.msra.mxu1 %v3205_v14 }
  0x65   :  { %2606 = vmatprep.subr.bf16.mxu0 %v3060_v0  ;;  %2612 = vmatprep.subr.bf16.mxu1 %v3060_v0 }
  0x67   :  { %2392 = vmatmul.mubr.msk.f32.vlgmr.msra.gmra.mrb[0].mxu0 %vm115_vm1, %v103_v15  ;;  %2403 = vmatmul.mubr.msk.f32.vlgmr.msra.gmra.mrb[0].mxu1 %vm115_vm1, %v201_v16 }
  0x68   :  { %2608 = vmatpush3.bf16.msra.mxu0 %v3201_v9  ;;  %2413 = vmatprep.mubr.msk.f32.mxu0 %vm3061_vm0, %v3062_v1 }
  0x69   :  { %2609 = vmatprep.subr.bf16.mxu0 %v3060_v0  ;;  %2614 = vmatpush3.bf16.msra.mxu1 %v3201_v9 }
  0x6a   :  { %2615 = vmatprep.subr.bf16.mxu1 %v3060_v0  ;;  %2424 = vmatprep.mubr.msk.f32.mxu1 %vm3061_vm0, %v3062_v1 }
  0x6c   :  { %2611 = vmatpush3.bf16.msra.mxu0 %v3205_v14 }
  0x6d   :  { %2617 = vmatpush3.bf16.msra.mxu1 %v3205_v14  ;;  %2618 = vmatprep.subr.bf16.mxu0 %v3060_v0 }
  0x6e   :  { %2624 = vmatprep.subr.bf16.mxu1 %v3060_v0 }
 0x13a   :  { %v2393_v18 = vpop.f32.mrb[0].mxu0  ;;  %v272_v19 = vpop.f32.mrb[0].mxu1 }
 0x13b   :  { %v3228_v20 = vadd.f32 %v2393_v18, %v2242_v17  ;;  %v188_v21 = vpop.f32.mrb[1].mxu0  ;;  %v2404_v22 = vpop.f32.mrb[1].mxu1 }
 0x13c   :  { %v3230_v23 = vadd.f32 %v2242_v17, %v188_v21 }
 0x13e   :  { %v276_v24 = vadd.f32 %v272_v19, %v3230_v23 }
 0x140   :  { %2729 = vtanh.f32 %v276_v24  ;;  %v2246_v27 = vmul.f32 -1.442695, %v276_v24 }
 0x142   :  { %2731 = vpow2.f32 %v2246_v27 }
 0x14a   :  { %v2730_v25 = vpop.eup %2729 }
 0x14b   :  { %290 = vrot.lane.b32.xlu0 %v2730_v25, %s3063_s20 }
 0x14c   :  { %v2732_v28 = vpop.eup %2731 }
 0x14d   :  { %v280_v29 = vadd.f32 1.0, %v2732_v28 }
 0x14f   :  { %285 = vrot.lane.b32.xlu0 %v202_v26, %s3052_s23  ;;  %2733 = vrcp.f32 %v280_v29 }
 0x159   :  { %v2734_v30 = vpop.eup %2733 }
 0x1bd   :  { %v291_v31 = vpop.permute.xlu0 %290 }
 0x1be   :  { %v293_v32 = vmul.f32 %v2734_v30, %v291_v31 }
 0x1c0   :  { %295 = vrot.lane.b32.xlu1 %v293_v32, %s3052_s23 }
 0x1c1   :  { %v286_v33 = vpop.permute.xlu0 %285 }
 0x1c2   :  { %v288_v34 = vmul.f32 %v2734_v30, %v286_v33 }
 0x232   :  { %v296_v35 = vpop.permute.xlu1 %295 }
 0x233   :  { %v298_v36 = vadd.f32 %v296_v35, %v288_v34 }
 0x235   :  { %2735 = vtanh.f32 %v298_v36  ;;  %v395_v52 = vrot.slane %v298_v36, 6 }
 0x23f   :  { %v2736_v37 = vpop.eup %2735 }
 0x240   :  { %301 = vrot.lane.b32.xlu1 %v2736_v37, %s3063_s20 }
 0x2b2   :  { %v302_v38 = vpop.permute.xlu1 %301 }
 0x2b3   :  { %v304_v39 = vmul.f32 %v2734_v30, %v302_v38 }
 0x2b5   :  { %306 = vrot.lane.b32.xlu0 %v304_v39, %s3052_s23 }
 0x327   :  { %v307_v40 = vpop.permute.xlu0 %306 }
 0x328   :  { %310 = vst.msk [vmem:[#allocation2] sm:$0x3] %vm309_vm2, %v307_v40  ;;  %2414 = vmatmul.mubr.msk.f32.vlgmr.msra.gmra.mrb[2].mxu0 %vm115_vm1, %v307_v40 }
 0x329   :  { %2620 = vmatpush3.bf16.msra.mxu0 %v3201_v9  ;;  %2435 = vmatprep.mubr.msk.f32.mxu0 %vm3061_vm0, %v3062_v1 }
 0x32a   :  { %2621 = vmatprep.subr.bf16.mxu0 %v3060_v0 }
 0x32d   :  { %2623 = vmatpush3.bf16.msra.mxu0 %v3205_v14 }
 0x32e   :  { %2630 = vmatprep.subr.bf16.mxu0 %v3060_v0 }
 0x3fb   :  { %v379_v41 = vpop.f32.mrb[2].mxu0 }
 0x3fc   :  { %v384_v42 = vrot.slane %v379_v41, 6  ;;  %v2415_v43 = vpop.f32.mrb[3].mxu0 }
 0x3fe   :  { %v386_v44 = vadd.f32 %v384_v42, %v3230_v23 }
 0x400   :  { %2737 = vtanh.f32 %v386_v44  ;;  %v2248_v46 = vmul.f32 -1.442695, %v386_v44 }
 0x402   :  { %2739 = vpow2.f32 %v2248_v46 }
 0x40a   :  { %v2738_v45 = vpop.eup %2737 }
 0x40b   :  { %399 = vrot.lane.b32.xlu1 %v2738_v45, %s3063_s20 }
 0x40c   :  { %v2740_v47 = vpop.eup %2739 }
 0x40d   :  { %v390_v48 = vadd.f32 1.0, %v2740_v47 }
 0x40f   :  { %2741 = vrcp.f32 %v390_v48 }
 0x419   :  { %v2742_v49 = vpop.eup %2741 }
 0x41a   :  { %v397_v53 = vmul.f32 %v2742_v49, %v395_v52 }
 0x47d   :  { %v400_v50 = vpop.permute.xlu1 %399 }
 0x47e   :  { %v402_v51 = vmul.f32 %v2742_v49, %v400_v50 }
 0x480   :  { %404 = vrot.lane.b32.xlu0 %v402_v51, %s3052_s23 }
 0x4f2   :  { %v405_v54 = vpop.permute.xlu0 %404 }
 0x4f3   :  { %v407_v55 = vadd.f32 %v405_v54, %v397_v53 }
 0x4f5   :  { %2743 = vtanh.f32 %v407_v55  ;;  %v507_v11 = vrot.slane %v407_v55, 6 }
 0x4ff   :  { %v2744_v56 = vpop.eup %2743 }
 0x500   :  { %410 = vrot.lane.b32.xlu1 %v2744_v56, %s3063_s20 }
 0x572   :  { %v411_v57 = vpop.permute.xlu1 %410 }
 0x573   :  { %v3253_v58 = vmul.f32 %v2742_v49, %v411_v57 }
 0x575   :  { %v420_v59 = vrot.slane %v3253_v58, 2 }
 0x577   :  { %421 = vrot.lane.b32.xlu0 %v420_v59, %s3052_s23 }
 0x5e9   :  { %v422_v60 = vpop.permute.xlu0 %421 }
 0x5ea   :  { %2425 = vmatmul.mubr.msk.f32.vlgmr.msra.gmra.mrb[2].mxu1 %vm115_vm1, %v422_v60 }
 0x5eb   :  { %2626 = vmatpush3.bf16.msra.mxu1 %v3201_v9  ;;  %2446 = vmatprep.mubr.msk.f32.mxu1 %vm3061_vm0, %v3062_v1 }
 0x5ec   :  { %2627 = vmatprep.subr.bf16.mxu1 %v3060_v0 }
 0x5ef   :  { %2629 = vmatpush3.bf16.msra.mxu1 %v3205_v14 }
 0x5f0   :  { %2636 = vmatprep.subr.bf16.mxu1 %v3060_v0 }
 0x6bd   :  { %v491_v61 = vpop.f32.mrb[2].mxu1 }
 0x6be   :  { %v496_v62 = vrot.slane %v491_v61, 4  ;;  %v2426_v63 = vpop.f32.mrb[3].mxu1 }
 0x6c0   :  { %v498_v2 = vadd.f32 %v496_v62, %v3230_v23 }
 0x6c2   :  { %2745 = vtanh.f32 %v498_v2  ;;  %v2250_v4 = vmul.f32 -1.442695, %v498_v2 }
 0x6c4   :  { %2747 = vpow2.f32 %v2250_v4 }
 0x6cc   :  { %v2746_v3 = vpop.eup %2745 }
 0x6cd   :  { %511 = vrot.lane.b32.xlu1 %v2746_v3, %s3063_s20 }
 0x6ce   :  { %v2748_v5 = vpop.eup %2747 }
 0x6cf   :  { %v502_v6 = vadd.f32 1.0, %v2748_v5 }
 0x6d1   :  { %2749 = vrcp.f32 %v502_v6 }
 0x6db   :  { %v2750_v7 = vpop.eup %2749 }
 0x6dc   :  { %v509_v12 = vmul.f32 %v2750_v7, %v507_v11 }
 0x73f   :  { %v512_v8 = vpop.permute.xlu1 %511 }
 0x740   :  { %v514_v10 = vmul.f32 %v2750_v7, %v512_v8 }
 0x742   :  { %516 = vrot.lane.b32.xlu0 %v514_v10, %s3052_s23 }
 0x7b4   :  { %v517_v13 = vpop.permute.xlu0 %516 }
 0x7b5   :  { %v519_v15 = vadd.f32 %v517_v13, %v509_v12 }
 0x7b7   :  { %2751 = vtanh.f32 %v519_v15  ;;  %v619_v34 = vrot.slane %v519_v15, 6 }
 0x7c1   :  { %v2752_v16 = vpop.eup %2751 }
 0x7c2   :  { %522 = vrot.lane.b32.xlu1 %v2752_v16, %s3063_s20 }
 0x834   :  { %v523_v17 = vpop.permute.xlu1 %522 }
 0x835   :  { %v3268_v18 = vmul.f32 %v2750_v7, %v523_v17 }
 0x837   :  { %v532_v19 = vrot.slane %v3268_v18, 4 }
 0x839   :  { %533 = vrot.lane.b32.xlu0 %v532_v19, %s3052_s23 }
 0x8ab   :  { %v534_v21 = vpop.permute.xlu0 %533 }
 0x8ac   :  { %2436 = vmatmul.mubr.msk.f32.vlgmr.msra.gmra.mrb[4].mxu0 %vm115_vm1, %v534_v21 }
 0x8ad   :  { %2632 = vmatpush3.bf16.msra.mxu0 %v3201_v9  ;;  %2457 = vmatprep.mubr.msk.f32.mxu0 %vm3061_vm0, %v3062_v1 }
 0x8ae   :  { %2633 = vmatprep.subr.bf16.mxu0 %v3060_v0 }
 0x8b1   :  { %2635 = vmatpush3.bf16.msra.mxu0 %v3205_v14 }
 0x8b2   :  { %2642 = vmatprep.subr.bf16.mxu0 %v3060_v0 }
 0x97f   :  { %v603_v22 = vpop.f32.mrb[4].mxu0 }
 0x980   :  { %v608_v24 = vrot.slane %v603_v22, 2  ;;  %v2437_v25 = vpop.f32.mrb[5].mxu0 }
 0x982   :  { %v610_v26 = vadd.f32 %v608_v24, %v3230_v23 }
 0x984   :  { %2753 = vtanh.f32 %v610_v26  ;;  %v2252_v28 = vmul.f32 -1.442695, %v610_v26 }
 0x986   :  { %2755 = vpow2.f32 %v2252_v28 }
 0x98e   :  { %v2754_v27 = vpop.eup %2753 }
 0x98f   :  { %623 = vrot.lane.b32.xlu1 %v2754_v27, %s3063_s20 }
 0x990   :  { %v2756_v29 = vpop.eup %2755 }
 0x991   :  { %v614_v30 = vadd.f32 1.0, %v2756_v29 }
 0x993   :  { %2757 = vrcp.f32 %v614_v30 }
 0x99d   :  { %v2758_v31 = vpop.eup %2757 }
 0x99e   :  { %v621_v35 = vmul.f32 %v2758_v31, %v619_v34 }
 0xa01   :  { %v624_v32 = vpop.permute.xlu1 %623 }
 0xa02   :  { %v626_v33 = vmul.f32 %v2758_v31, %v624_v32 }
 0xa04   :  { %628 = vrot.lane.b32.xlu0 %v626_v33, %s3052_s23 }
 0xa76   :  { %v629_v36 = vpop.permute.xlu0 %628 }
 0xa77   :  { %v631_v37 = vadd.f32 %v629_v36, %v621_v35 }
 0xa79   :  { %2759 = vtanh.f32 %v631_v37  ;;  %v728_v52 = vrot.slane %v631_v37, 6 }
 0xa83   :  { %v2760_v23 = vpop.eup %2759 }
 0xa84   :  { %634 = vrot.lane.b32.xlu1 %v2760_v23, %s3063_s20 }
 0xaf6   :  { %v635_v38 = vpop.permute.xlu1 %634 }
 0xaf7   :  { %v3283_v39 = vmul.f32 %v2758_v31, %v635_v38 }
 0xaf9   :  { %v644_v40 = vrot.slane %v3283_v39, 6 }
 0xafb   :  { %645 = vrot.lane.b32.xlu0 %v644_v40, %s3052_s23 }
 0xb6d   :  { %v646_v41 = vpop.permute.xlu0 %645 }
 0xb6e   :  { %2447 = vmatmul.mubr.msk.f32.vlgmr.msra.gmra.mrb[4].mxu1 %vm115_vm1, %v646_v41 }
 0xb6f   :  { %2638 = vmatpush3.bf16.msra.mxu1 %v3201_v9  ;;  %2468 = vmatprep.mubr.msk.f32.mxu1 %vm3061_vm0, %v3062_v1 }
 0xb70   :  { %2639 = vmatprep.subr.bf16.mxu1 %v3060_v0 }
 0xb73   :  { %2641 = vmatpush3.bf16.msra.mxu1 %v3205_v14 }
 0xc41   :  { %v715_v42 = vpop.f32.mrb[4].mxu1 }
 0xc42   :  { %v719_v43 = vadd.f32 %v715_v42, %v3228_v20  ;;  %v2448_v44 = vpop.f32.mrb[5].mxu1 }
 0xc44   :  { %2761 = vtanh.f32 %v719_v43  ;;  %v2254_v46 = vmul.f32 -1.442695, %v719_v43 }
 0xc46   :  { %2763 = vpow2.f32 %v2254_v46 }
 0xc4e   :  { %v2762_v45 = vpop.eup %2761 }
 0xc4f   :  { %732 = vrot.lane.b32.xlu1 %v2762_v45, %s3063_s20 }
 0xc50   :  { %v2764_v47 = vpop.eup %2763 }
 0xc51   :  { %v723_v48 = vadd.f32 1.0, %v2764_v47 }
 0xc53   :  { %2765 = vrcp.f32 %v723_v48 }
 0xc5d   :  { %v2766_v49 = vpop.eup %2765 }
 0xc5e   :  { %v730_v53 = vmul.f32 %v2766_v49, %v728_v52 }
 0xcc1   :  { %v733_v50 = vpop.permute.xlu1 %732 }
 0xcc2   :  { %v735_v51 = vmul.f32 %v2766_v49, %v733_v50 }
 0xcc4   :  { %737 = vrot.lane.b32.xlu0 %v735_v51, %s3052_s23 }
 0xd36   :  { %v738_v54 = vpop.permute.xlu0 %737 }
 0xd37   :  { %v740_v55 = vadd.f32 %v738_v54, %v730_v53 }
 0xd39   :  { %2767 = vtanh.f32 %v740_v55 }
 0xd43   :  { %v2768_v56 = vpop.eup %2767 }
 0xd44   :  { %743 = vrot.lane.b32.xlu1 %v2768_v56, %s3063_s20 }
 0xdb6   :  { %v744_v57 = vpop.permute.xlu1 %743 }
 0xdb7   :  { %v746_v59 = vmul.f32 %v2766_v49, %v744_v57 }
 0xdb9   :  { %748 = vrot.lane.b32.xlu0 %v746_v59, %s3052_s23  ;;  %v1091_v59 = vld [vmem:[#allocation8 + $0x20] sm:$0xff] }
 0xe2b   :  { %v749_v60 = vpop.permute.xlu0 %748 }
 0xe2c   :  { %751 = vst.msk [vmem:[#allocation2 + $0x8] sm:$0x3] %vm309_vm2, %v749_v60  ;;  %2458 = vmatmul.mubr.msk.f32.vlgmr.msra.gmra.mrb[6].mxu0 %vm115_vm1, %v749_v60  ;;  %v1092_v60 = vld [vmem:[#allocation8 + $0x28] sm:$0xff] }
 0xe2d   :  { %2644 = vmatpush3.bf16.msra.mxu0 %v3201_v9  ;;  %2479 = vmatprep.mubr.msk.f32.mxu0 %vm3061_vm0, %v3062_v1 }
 0xe2e   :  { %2645 = vmatprep.subr.bf16.mxu0 %v3060_v0 }
 0xe31   :  { %2647 = vmatpush3.bf16.msra.mxu0 %v3205_v14  ;;  %v836_v14 = vrot.slane %v740_v55, 6 }
 0xe32   :  { %2656 = vmatprep.subr.bf16.mxu0 %v3060_v0 }
 0xeff   :  { %v820_v61 = vpop.f32.mrb[6].mxu0 }
 0xf00   :  { %v825_v62 = vrot.slane %v820_v61, 6  ;;  %v2459_v63 = vpop.f32.mrb[7].mxu0  ;;  %v2648_v61 = vpack.c.bf16 %v1092_v60, %v1091_v59 }
 0xf01   :  { %v1186_v63 = vld [vmem:[#allocation9 + $0x28] sm:$0xff] }
 0xf02   :  { %v827_v2 = vadd.f32 %v825_v62, %v3228_v20  ;;  %2649 = vmatprep.subr.bf16.mxu1 %v2648_v61  ;;  %v1185_v62 = vld [vmem:[#allocation9 + $0x20] sm:$0xff] }
 0xf04   :  { %2769 = vtanh.f32 %v827_v2  ;;  %v2256_v4 = vmul.f32 -1.442695, %v827_v2  ;;  %v1093_v2 = vld [vmem:[#allocation8 + $0x30] sm:$0xff] }
 0xf06   :  { %2771 = vpow2.f32 %v2256_v4  ;;  %v1094_v4 = vld [vmem:[#allocation8 + $0x38] sm:$0xff] }
 0xf0e   :  { %v2770_v3 = vpop.eup %2769 }
 0xf0f   :  { %840 = vrot.lane.b32.xlu1 %v2770_v3, %s3063_s20  ;;  %v3342_v3 = vpack.c.bf16 %v1186_v63, %v1185_v62 }
 0xf10   :  { %v2772_v9 = vpop.eup %2771 }
 0xf11   :  { %v831_v5 = vadd.f32 1.0, %v2772_v9  ;;  %v1187_v9 = vld [vmem:[#allocation9 + $0x30] sm:$0xff] }
 0xf13   :  { %2773 = vrcp.f32 %v831_v5  ;;  %v1188_v5 = vld [vmem:[#allocation9 + $0x38] sm:$0xff] }
 0xf1d   :  { %v2774_v6 = vpop.eup %2773 }
 0xf1e   :  { %v838_v10 = vmul.f32 %v2774_v6, %v836_v14 }
 0xf81   :  { %v841_v7 = vpop.permute.xlu1 %840 }
 0xf82   :  { %v843_v8 = vmul.f32 %v2774_v6, %v841_v7  ;;  %v1190_v7 = vld [vmem:[#allocation6 + $0x2] sm:$0x3] }
 0xf84   :  { %845 = vrot.lane.b32.xlu0 %v843_v8, %s3052_s23 }
 0xff6   :  { %v846_v11 = vpop.permute.xlu0 %845 }
 0xff7   :  { %v848_v12 = vadd.f32 %v846_v11, %v838_v10  ;;  %v2265_v11 = vld [vmem:[%s3542_s2 + $0x2] sm:$0x3] }
 0xff9   :  { %2775 = vtanh.f32 %v848_v12  ;;  %v947_v33 = vrot.slane %v848_v12, 6 }
0x1003   :  { %v2776_v13 = vpop.eup %2775 }
0x1004   :  { %851 = vrot.lane.b32.xlu1 %v2776_v13, %s3063_s20 }
0x1076   :  { %v852_v15 = vpop.permute.xlu1 %851 }
0x1077   :  { %v3310_v16 = vmul.f32 %v2774_v6, %v852_v15  ;;  %v2652_v6 = vpack.c.bf16 %v1094_v4, %v1093_v2 }
0x1079   :  { %v860_v17 = vrot.slane %v3310_v16, 2 }
0x107b   :  { %861 = vrot.lane.b32.xlu0 %v860_v17, %s3052_s23 }
0x10ed   :  { %v862_v19 = vpop.permute.xlu0 %861 }
0x10ee   :  { %2469 = vmatmul.mubr.msk.f32.vlgmr.msra.gmra.mrb[6].mxu1 %vm115_vm1, %v862_v19 }
0x10ef   :  { %2651 = vmatpush3.bf16.msra.mxu1 %v2648_v61 }
0x10f0   :  { %2653 = vmatprep.subr.bf16.mxu1 %v2652_v6 }
0x10f3   :  { %2655 = vmatpush3.bf16.msra.mxu1 %v2652_v6 }
0x10f4   :  { %2662 = vmatprep.subr.bf16.mxu1 %v3060_v0 }
0x11c1   :  { %v931_v21 = vpop.f32.mrb[6].mxu1 }
0x11c2   :  { %v936_v22 = vrot.slane %v931_v21, 4  ;;  %v2470_v24 = vpop.f32.mrb[7].mxu1  ;;  %v2262_v21 = vld [vmem:[%s3545_s5 + $0x1] ss:$0 sm:$0xff] }
0x11c4   :  { %v938_v25 = vadd.f32 %v936_v22, %v3228_v20 }
0x11c6   :  { %2777 = vtanh.f32 %v938_v25  ;;  %v2258_v27 = vmul.f32 -1.442695, %v938_v25 }
0x11c8   :  { %2779 = vpow2.f32 %v2258_v27 }
0x11d0   :  { %v2778_v26 = vpop.eup %2777 }
0x11d1   :  { %951 = vrot.lane.b32.xlu1 %v2778_v26, %s3063_s20 }
0x11d2   :  { %v2780_v28 = vpop.eup %2779 }
0x11d3   :  { %v942_v29 = vadd.f32 1.0, %v2780_v28 }
0x11d5   :  { %2781 = vrcp.f32 %v942_v29 }
0x11df   :  { %v2782_v30 = vpop.eup %2781 }
0x11e0   :  { %v949_v34 = vmul.f32 %v2782_v30, %v947_v33 }
0x1243   :  { %v952_v31 = vpop.permute.xlu1 %951 }
0x1244   :  { %v954_v32 = vmul.f32 %v2782_v30, %v952_v31 }
0x1246   :  { %956 = vrot.lane.b32.xlu0 %v954_v32, %s3052_s23 }
0x12b8   :  { %v957_v35 = vpop.permute.xlu0 %956 }
0x12b9   :  { %v959_v36 = vadd.f32 %v957_v35, %v949_v34 }
0x12bb   :  { %2783 = vtanh.f32 %v959_v36 }
0x12c5   :  { %v2784_v37 = vpop.eup %2783 }
0x12c6   :  { %962 = vrot.lane.b32.xlu1 %v2784_v37, %s3063_s20 }
0x1338   :  { %v963_v23 = vpop.permute.xlu1 %962 }
0x1339   :  { %v965_v38 = vmul.f32 %v2782_v30, %v963_v23 }
0x133b   :  { %v971_v40 = vrot.slane %v965_v38, 4 }
0x133d   :  { %972 = vrot.lane.b32.xlu0 %v971_v40, %s3052_s23 }
0x13af   :  { %v973_v41 = vpop.permute.xlu0 %972 }
0x13b0   :  { %2480 = vmatmul.mubr.msk.f32.vlgmr.msra.gmra.mrb[8].mxu0 %vm115_vm1, %v973_v41 }
0x13b1   :  { %2501 = vmatprep.mubr.msk.f32.mxu0 %vm3061_vm0, %v3062_v1  ;;  %2658 = vmatpush3.bf16.msra.mxu0 %v3342_v3 }
0x13b2   :  { %2659 = vmatprep.subr.bf16.mxu0 %v3060_v0 }
0x1483   :  { %v1042_v42 = vpop.f32.mrb[8].mxu0 }
0x1484   :  { %v1047_v43 = vrot.slane %v1042_v42, 2  ;;  %v2481_v44 = vpop.f32.mrb[9].mxu0 }
0x1486   :  { %v1049_v45 = vadd.f32 %v1047_v43, %v3228_v20  ;;  %v1058_v20 = vrot.slane %v959_v36, 6 }
0x1488   :  { %2785 = vtanh.f32 %v1049_v45  ;;  %v2260_v47 = vmul.f32 -1.442695, %v1049_v45 }
0x148a   :  { %2787 = vpow2.f32 %v2260_v47 }
0x1492   :  { %v2786_v46 = vpop.eup %2785 }
0x1493   :  { %1062 = vrot.lane.b32.xlu1 %v2786_v46, %s3063_s20 }
0x1494   :  { %v2788_v48 = vpop.eup %2787 }
0x1495   :  { %v1053_v49 = vadd.f32 1.0, %v2788_v48 }
0x1497   :  { %2789 = vrcp.f32 %v1053_v49 }
0x14a1   :  { %v2790_v50 = vpop.eup %2789 }
0x14a2   :  { %v1060_v53 = vmul.f32 %v2790_v50, %v1058_v20 }
0x1505   :  { %v1063_v51 = vpop.permute.xlu1 %1062 }
0x1506   :  { %v1065_v52 = vmul.f32 %v2790_v50, %v1063_v51 }
0x1508   :  { %1067 = vrot.lane.b32.xlu0 %v1065_v52, %s3052_s23 }
0x150c   :  { %415 = vrot.lane.b32.xlu0 %v3253_v58, %s3052_s23 }
0x1510   :  { %639 = vrot.lane.b32.xlu0 %v3283_v39, %s3052_s23 }
0x1514   :  { %967 = vrot.lane.b32.xlu0 %v965_v38, %s3052_s23 }
0x157a   :  { %v1068_v54 = vpop.permute.xlu0 %1067 }
0x157b   :  { %v3331_v55 = vadd.f32 %v1068_v54, %v1060_v53 }
0x157d   :  { %2791 = vtanh.f32 %v3331_v55 }
0x157e   :  { %v416_v56 = vpop.permute.xlu0 %415 }
0x157f   :  { %419 = vst.msk [vmem:[#allocation2] sm:$0xc] %vm418_vm3, %v416_v56 }
0x1582   :  { %v640_v57 = vpop.permute.xlu0 %639 }
0x1583   :  { %643 = vst.msk [vmem:[#allocation2] sm:$0xc0] %vm642_vm4, %v640_v57 }
0x1586   :  { %v968_v58 = vpop.permute.xlu0 %967 }
0x1587   :  { %v2792_v39 = vpop.eup %2791  ;;  %970 = vst.msk [vmem:[#allocation2 + $0x8] sm:$0x30] %vm530_vm5, %v968_v58 }
0x1588   :  { %1073 = vrot.lane.b32.xlu1 %v2792_v39, %s3063_s20 }
0x158c   :  { %527 = vrot.lane.b32.xlu1 %v3268_v18, %s3052_s23  ;;  %v3345_v18 = vpack.c.bf16 %v1188_v5, %v1187_v9 }
0x158e   :  { %2661 = vmatpush3.bf16.msra.mxu0 %v3345_v18 }
0x158f   :  { %2668 = vmatprep.subr.bf16.mxu0 %v3060_v0 }
0x1590   :  { %856 = vrot.lane.b32.xlu1 %v3310_v16, %s3052_s23 }
0x1591   :  { %2502 = vmatmul.mubr.msk.f32.vlgmr.msra.gmra.mrb[10].mxu0 %vm115_vm1, %v1190_v7 }
0x1592   :  { %2670 = vmatpush3.bf16.msra.mxu0 %v3342_v3  ;;  %2523 = vmatprep.mubr.msk.f32.mxu0 %vm3061_vm0, %v3062_v1 }
0x1593   :  { %2671 = vmatprep.subr.bf16.mxu0 %v3060_v0 }
0x1596   :  { %2673 = vmatpush3.bf16.msra.mxu0 %v3345_v18 }
0x1597   :  { %2680 = vmatprep.subr.bf16.mxu0 %v3060_v0 }
0x15fa   :  { %v1074_v8 = vpop.permute.xlu1 %1073 }
0x15fb   :  { %v1076_v14 = vmul.f32 %v2790_v50, %v1074_v8 }
0x15fd   :  { %1078 = vrot.lane.b32.xlu1 %v1076_v14, %s3052_s23 }
0x15fe   :  { %v528_v10 = vpop.permute.xlu1 %527 }
0x15ff   :  { %531 = vst.msk [vmem:[#allocation2] sm:$0x30] %vm530_vm5, %v528_v10 }
0x1601   :  { %1275 = vrot.lane.b32.xlu1 %v2265_v11, %s3052_s23 }
0x1602   :  { %v857_v12 = vpop.permute.xlu1 %856 }
0x1603   :  { %859 = vst.msk [vmem:[#allocation2 + $0x8] sm:$0xc] %vm418_vm3, %v857_v12 }
0x1606   :  { %v1088_v13 = vld [vmem:[#allocation2] sm:$0xff] }
0x1607   :  { %2490 = vmatprep.mubr.msk.f32.mxu1 %vm115_vm1, %v1088_v13 }
0x1664   :  { %v1262_v17 = vpop.f32.mrb[10].mxu0 }
0x1665   :  { %v2503_v19 = vpop.f32.mrb[11].mxu0 }
0x166f   :  { %v1079_v15 = vpop.permute.xlu1 %1078 }
0x1670   :  { %1081 = vst.msk [vmem:[#allocation2 + $0x8] sm:$0xc0] %vm642_vm4, %v1079_v15  ;;  %1082 = vst.msk [vmem:[#allocation13 - $0x6] sm:$0xc0] %vm642_vm4, %v1079_v15 }
0x1673   :  { %v1276_v35 = vpop.permute.xlu1 %1275 }
0x1677   :  { %v1089_v16 = vld [vmem:[#allocation2 + $0x8] sm:$0xff] }
0x1678   :  { %2491 = vmatmul.mubr.msk.f32.vlgmr.msra.gmra.mrb[8].mxu1 %vm115_vm1, %v1089_v16 }
0x1679   :  { %2664 = vmatpush3.bf16.msra.mxu1 %v3342_v3  ;;  %2512 = vmatprep.mubr.msk.f32.mxu1 %vm3061_vm0, %v3062_v1 }
0x167a   :  { %2665 = vmatprep.subr.bf16.mxu1 %v3060_v0 }
0x167d   :  { %2667 = vmatpush3.bf16.msra.mxu1 %v3345_v18 }
0x167e   :  { %2674 = vmatprep.subr.bf16.mxu1 %v3060_v0 }
0x174b   :  { %v2492_v22 = vpop.f32.mrb[8].mxu1 }
0x174c   :  { %v3378_v24 = vadd.f32 %v2492_v22, %v2262_v21  ;;  %v1175_v25 = vpop.f32.mrb[9].mxu1 }
0x174d   :  { %v3380_v26 = vadd.f32 %v2262_v21, %v1175_v25 }
0x174f   :  { %v1266_v27 = vadd.f32 %v1262_v17, %v3380_v26 }
0x1751   :  { %2793 = vtanh.f32 %v1266_v27  ;;  %v2267_v29 = vmul.f32 -1.442695, %v1266_v27 }
0x1753   :  { %2795 = vpow2.f32 %v2267_v29 }
0x175b   :  { %v2794_v28 = vpop.eup %2793 }
0x175c   :  { %1280 = vrot.lane.b32.xlu0 %v2794_v28, %s3063_s20 }
0x175d   :  { %v2796_v30 = vpop.eup %2795 }
0x175e   :  { %v1270_v31 = vadd.f32 1.0, %v2796_v30 }
0x1760   :  { %2797 = vrcp.f32 %v1270_v31 }
0x176a   :  { %v2798_v32 = vpop.eup %2797 }
0x176b   :  { %v1278_v36 = vmul.f32 %v2798_v32, %v1276_v35 }
0x17ce   :  { %v1281_v33 = vpop.permute.xlu0 %1280 }
0x17cf   :  { %v1283_v34 = vmul.f32 %v2798_v32, %v1281_v33 }
0x17d1   :  { %1285 = vrot.lane.b32.xlu0 %v1283_v34, %s3052_s23 }
0x1843   :  { %v1286_v37 = vpop.permute.xlu0 %1285 }
0x1844   :  { %v1288_v23 = vadd.f32 %v1286_v37, %v1278_v36 }
0x1846   :  { %2799 = vtanh.f32 %v1288_v23  ;;  %v1384_v53 = vrot.slane %v1288_v23, 6 }
0x1850   :  { %v2800_v38 = vpop.eup %2799 }
0x1851   :  { %1291 = vrot.lane.b32.xlu1 %v2800_v38, %s3063_s20 }
0x18c3   :  { %v1292_v40 = vpop.permute.xlu1 %1291 }
0x18c4   :  { %v1294_v41 = vmul.f32 %v2798_v32, %v1292_v40 }
0x18c6   :  { %1296 = vrot.lane.b32.xlu0 %v1294_v41, %s3052_s23 }
0x1938   :  { %v1297_v42 = vpop.permute.xlu0 %1296 }
0x1939   :  { %1299 = vst.msk [vmem:[#allocation2] sm:$0x3] %vm309_vm2, %v1297_v42  ;;  %2513 = vmatmul.mubr.msk.f32.vlgmr.msra.gmra.mrb[10].mxu1 %vm115_vm1, %v1297_v42 }
0x193a   :  { %2676 = vmatpush3.bf16.msra.mxu1 %v3342_v3  ;;  %2534 = vmatprep.mubr.msk.f32.mxu1 %vm3061_vm0, %v3062_v1 }
0x193b   :  { %2677 = vmatprep.subr.bf16.mxu1 %v3060_v0 }
0x193e   :  { %2679 = vmatpush3.bf16.msra.mxu1 %v3345_v18 }
0x193f   :  { %2686 = vmatprep.subr.bf16.mxu1 %v3060_v0 }
0x1a0c   :  { %v1368_v43 = vpop.f32.mrb[10].mxu1 }
0x1a0d   :  { %v1373_v44 = vrot.slane %v1368_v43, 6  ;;  %v2514_v45 = vpop.f32.mrb[11].mxu1 }
0x1a0f   :  { %v1375_v46 = vadd.f32 %v1373_v44, %v3380_v26 }
0x1a11   :  { %2801 = vtanh.f32 %v1375_v46  ;;  %v2269_v48 = vmul.f32 -1.442695, %v1375_v46 }
0x1a13   :  { %2803 = vpow2.f32 %v2269_v48 }
0x1a1b   :  { %v2802_v47 = vpop.eup %2801 }
0x1a1c   :  { %1388 = vrot.lane.b32.xlu1 %v2802_v47, %s3063_s20 }
0x1a1d   :  { %v2804_v49 = vpop.eup %2803 }
0x1a1e   :  { %v1379_v50 = vadd.f32 1.0, %v2804_v49 }
0x1a20   :  { %2805 = vrcp.f32 %v1379_v50 }
0x1a2a   :  { %v2806_v51 = vpop.eup %2805 }
0x1a2b   :  { %v1386_v54 = vmul.f32 %v2806_v51, %v1384_v53 }
0x1a8e   :  { %v1389_v52 = vpop.permute.xlu1 %1388 }
0x1a8f   :  { %v1391_v20 = vmul.f32 %v2806_v51, %v1389_v52 }
0x1a91   :  { %1393 = vrot.lane.b32.xlu0 %v1391_v20, %s3052_s23 }
0x1b03   :  { %v1394_v56 = vpop.permute.xlu0 %1393 }
0x1b04   :  { %v1396_v57 = vadd.f32 %v1394_v56, %v1386_v54 }
0x1b06   :  { %2807 = vtanh.f32 %v1396_v57  ;;  %v1495_v11 = vrot.slane %v1396_v57, 6 }
0x1b10   :  { %v2808_v58 = vpop.eup %2807 }
0x1b11   :  { %1399 = vrot.lane.b32.xlu1 %v2808_v58, %s3063_s20 }
0x1b83   :  { %v1400_v39 = vpop.permute.xlu1 %1399 }
0x1b84   :  { %v3399_v59 = vmul.f32 %v2806_v51, %v1400_v39 }
0x1b86   :  { %v1408_v60 = vrot.slane %v3399_v59, 2 }
0x1b88   :  { %1409 = vrot.lane.b32.xlu0 %v1408_v60, %s3052_s23 }
0x1bfa   :  { %v1410_v61 = vpop.permute.xlu0 %1409 }
0x1bfb   :  { %2524 = vmatmul.mubr.msk.f32.vlgmr.msra.gmra.mrb[12].mxu0 %vm115_vm1, %v1410_v61 }
0x1bfc   :  { %2682 = vmatpush3.bf16.msra.mxu0 %v3342_v3  ;;  %2545 = vmatprep.mubr.msk.f32.mxu0 %vm3061_vm0, %v3062_v1 }
0x1bfd   :  { %2683 = vmatprep.subr.bf16.mxu0 %v3060_v0 }
0x1c00   :  { %2685 = vmatpush3.bf16.msra.mxu0 %v3345_v18 }
0x1c01   :  { %2692 = vmatprep.subr.bf16.mxu0 %v3060_v0 }
0x1cce   :  { %v1479_v62 = vpop.f32.mrb[12].mxu0 }
0x1ccf   :  { %v1484_v63 = vrot.slane %v1479_v62, 4  ;;  %v2525_v2 = vpop.f32.mrb[13].mxu0 }
0x1cd1   :  { %v1486_v4 = vadd.f32 %v1484_v63, %v3380_v26 }
0x1cd3   :  { %2809 = vtanh.f32 %v1486_v4  ;;  %v2271_v5 = vmul.f32 -1.442695, %v1486_v4 }
0x1cd5   :  { %2811 = vpow2.f32 %v2271_v5 }
0x1cdd   :  { %v2810_v9 = vpop.eup %2809 }
0x1cde   :  { %1499 = vrot.lane.b32.xlu1 %v2810_v9, %s3063_s20 }
0x1cdf   :  { %v2812_v6 = vpop.eup %2811 }
0x1ce0   :  { %v1490_v7 = vadd.f32 1.0, %v2812_v6 }
0x1ce2   :  { %2813 = vrcp.f32 %v1490_v7 }
0x1cec   :  { %v2814_v8 = vpop.eup %2813 }
0x1ced   :  { %v1497_v12 = vmul.f32 %v2814_v8, %v1495_v11 }
0x1d50   :  { %v1500_v14 = vpop.permute.xlu1 %1499 }
0x1d51   :  { %v1502_v10 = vmul.f32 %v2814_v8, %v1500_v14 }
0x1d53   :  { %1504 = vrot.lane.b32.xlu0 %v1502_v10, %s3052_s23 }
0x1dc5   :  { %v1505_v13 = vpop.permute.xlu0 %1504 }
0x1dc6   :  { %v1507_v15 = vadd.f32 %v1505_v13, %v1497_v12 }
0x1dc8   :  { %2815 = vtanh.f32 %v1507_v15  ;;  %v1606_v37 = vrot.slane %v1507_v15, 6 }
0x1dd2   :  { %v2816_v16 = vpop.eup %2815 }
0x1dd3   :  { %1510 = vrot.lane.b32.xlu1 %v2816_v16, %s3063_s20 }
0x1e45   :  { %v1511_v17 = vpop.permute.xlu1 %1510 }
0x1e46   :  { %v3414_v19 = vmul.f32 %v2814_v8, %v1511_v17 }
0x1e48   :  { %v1519_v21 = vrot.slane %v3414_v19, 4 }
0x1e4a   :  { %1520 = vrot.lane.b32.xlu0 %v1519_v21, %s3052_s23 }
0x1ebc   :  { %v1521_v22 = vpop.permute.xlu0 %1520 }
0x1ebd   :  { %2535 = vmatmul.mubr.msk.f32.vlgmr.msra.gmra.mrb[12].mxu1 %vm115_vm1, %v1521_v22 }
0x1ebe   :  { %2688 = vmatpush3.bf16.msra.mxu1 %v3342_v3  ;;  %2556 = vmatprep.mubr.msk.f32.mxu1 %vm3061_vm0, %v3062_v1 }
0x1ebf   :  { %2689 = vmatprep.subr.bf16.mxu1 %v3060_v0 }
0x1ec2   :  { %2691 = vmatpush3.bf16.msra.mxu1 %v3345_v18 }
0x1ec3   :  { %2698 = vmatprep.subr.bf16.mxu1 %v3060_v0 }
0x1f90   :  { %v1590_v25 = vpop.f32.mrb[12].mxu1 }
0x1f91   :  { %v1595_v27 = vrot.slane %v1590_v25, 2  ;;  %v2536_v28 = vpop.f32.mrb[13].mxu1 }
0x1f93   :  { %v1597_v29 = vadd.f32 %v1595_v27, %v3380_v26 }
0x1f95   :  { %2817 = vtanh.f32 %v1597_v29  ;;  %v2273_v31 = vmul.f32 -1.442695, %v1597_v29 }
0x1f97   :  { %2819 = vpow2.f32 %v2273_v31 }
0x1f9f   :  { %v2818_v30 = vpop.eup %2817 }
0x1fa0   :  { %1610 = vrot.lane.b32.xlu1 %v2818_v30, %s3063_s20 }
0x1fa1   :  { %v2820_v32 = vpop.eup %2819 }
0x1fa2   :  { %v1601_v33 = vadd.f32 1.0, %v2820_v32 }
0x1fa4   :  { %2821 = vrcp.f32 %v1601_v33 }
0x1fae   :  { %v2822_v34 = vpop.eup %2821 }
0x1faf   :  { %v1608_v23 = vmul.f32 %v2822_v34, %v1606_v37 }
0x2012   :  { %v1611_v35 = vpop.permute.xlu1 %1610 }
0x2013   :  { %v1613_v36 = vmul.f32 %v2822_v34, %v1611_v35 }
0x2015   :  { %1615 = vrot.lane.b32.xlu0 %v1613_v36, %s3052_s23 }
0x2087   :  { %v1616_v38 = vpop.permute.xlu0 %1615 }
0x2088   :  { %v1618_v40 = vadd.f32 %v1616_v38, %v1608_v23 }
0x208a   :  { %2823 = vtanh.f32 %v1618_v40  ;;  %v1714_v54 = vrot.slane %v1618_v40, 6 }
0x2094   :  { %v2824_v26 = vpop.eup %2823 }
0x2095   :  { %1621 = vrot.lane.b32.xlu1 %v2824_v26, %s3063_s20 }
0x2107   :  { %v1622_v41 = vpop.permute.xlu1 %1621 }
0x2108   :  { %v3429_v42 = vmul.f32 %v2822_v34, %v1622_v41 }
0x210a   :  { %v1630_v43 = vrot.slane %v3429_v42, 6 }
0x210c   :  { %1631 = vrot.lane.b32.xlu0 %v1630_v43, %s3052_s23 }
0x217e   :  { %v1632_v44 = vpop.permute.xlu0 %1631 }
0x217f   :  { %2546 = vmatmul.mubr.msk.f32.vlgmr.msra.gmra.mrb[14].mxu0 %vm115_vm1, %v1632_v44 }
0x2180   :  { %2694 = vmatpush3.bf16.msra.mxu0 %v3342_v3  ;;  %2567 = vmatprep.mubr.msk.f32.mxu0 %vm3061_vm0, %v3062_v1 }
0x2181   :  { %2695 = vmatprep.subr.bf16.mxu0 %v3060_v0 }
0x2184   :  { %2697 = vmatpush3.bf16.msra.mxu0 %v3345_v18 }
0x2252   :  { %v1701_v45 = vpop.f32.mrb[14].mxu0 }
0x2253   :  { %v1705_v46 = vadd.f32 %v1701_v45, %v3378_v24  ;;  %v2547_v47 = vpop.f32.mrb[15].mxu0 }
0x2255   :  { %2825 = vtanh.f32 %v1705_v46  ;;  %v2275_v49 = vmul.f32 -1.442695, %v1705_v46 }
0x2257   :  { %2827 = vpow2.f32 %v2275_v49 }
0x225f   :  { %v2826_v48 = vpop.eup %2825 }
0x2260   :  { %1718 = vrot.lane.b32.xlu1 %v2826_v48, %s3063_s20 }
0x2261   :  { %v2828_v50 = vpop.eup %2827 }
0x2262   :  { %v1709_v51 = vadd.f32 1.0, %v2828_v50 }
0x2264   :  { %2829 = vrcp.f32 %v1709_v51 }
0x226e   :  { %v2830_v52 = vpop.eup %2829 }
0x226f   :  { %v1716_v56 = vmul.f32 %v2830_v52, %v1714_v54 }
0x22d2   :  { %v1719_v20 = vpop.permute.xlu1 %1718 }
0x22d3   :  { %v1721_v53 = vmul.f32 %v2830_v52, %v1719_v20 }
0x22d5   :  { %1723 = vrot.lane.b32.xlu0 %v1721_v53, %s3052_s23 }
0x2347   :  { %v1724_v57 = vpop.permute.xlu0 %1723 }
0x2348   :  { %v1726_v58 = vadd.f32 %v1724_v57, %v1716_v56 }
0x234a   :  { %2831 = vtanh.f32 %v1726_v58 }
0x2354   :  { %v2832_v39 = vpop.eup %2831 }
0x2355   :  { %1729 = vrot.lane.b32.xlu1 %v2832_v39, %s3063_s20 }
0x23c7   :  { %v1730_v60 = vpop.permute.xlu1 %1729 }
0x23c8   :  { %v1732_v61 = vmul.f32 %v2830_v52, %v1730_v60 }
0x23ca   :  { %1734 = vrot.lane.b32.xlu0 %v1732_v61, %s3052_s23 }
0x243c   :  { %v1735_v62 = vpop.permute.xlu0 %1734 }
0x243d   :  { %1737 = vst.msk [vmem:[#allocation2 + $0x8] sm:$0x3] %vm309_vm2, %v1735_v62  ;;  %2557 = vmatmul.mubr.msk.f32.vlgmr.msra.gmra.mrb[14].mxu1 %vm115_vm1, %v1735_v62 }
0x243e   :  { %2700 = vmatpush3.bf16.msra.mxu1 %v3342_v3  ;;  %2578 = vmatprep.mubr.msk.f32.mxu1 %vm3061_vm0, %v3062_v1 }
0x243f   :  { %2701 = vmatprep.subr.bf16.mxu1 %v3060_v0  ;;  %v1822_v0 = vrot.slane %v1726_v58, 6 }
0x2442   :  { %2703 = vmatpush3.bf16.msra.mxu1 %v3345_v18 }
0x2510   :  { %v1806_v63 = vpop.f32.mrb[14].mxu1 }
0x2511   :  { %v1811_v2 = vrot.slane %v1806_v63, 6  ;;  %v2558_v4 = vpop.f32.mrb[15].mxu1  ;;  %v2080_v63 = vld [vmem:[#allocation11 + $0x10] sm:$0xff] }
0x2513   :  { %v1813_v9 = vadd.f32 %v1811_v2, %v3378_v24  ;;  %v2081_v2 = vld [vmem:[#allocation11 + $0x18] sm:$0xff] }
0x2514   :  { %v2708_v4 = vpack.c.bf16 %v2081_v2, %v2080_v63 }
0x2515   :  { %2833 = vtanh.f32 %v1813_v9  ;;  %v2277_v6 = vmul.f32 -1.442695, %v1813_v9 }
0x2517   :  { %2835 = vpow2.f32 %v2277_v6 }
0x251f   :  { %v2834_v5 = vpop.eup %2833 }
0x2520   :  { %1826 = vrot.lane.b32.xlu1 %v2834_v5, %s3063_s20 }
0x2521   :  { %v2836_v7 = vpop.eup %2835 }
0x2522   :  { %v1817_v3 = vadd.f32 1.0, %v2836_v7 }
0x2524   :  { %2837 = vrcp.f32 %v1817_v3 }
0x252e   :  { %v2838_v8 = vpop.eup %2837 }
0x252f   :  { %v1824_v18 = vmul.f32 %v2838_v8, %v1822_v0 }
0x2592   :  { %v1827_v1 = vpop.permute.xlu1 %1826 }
0x2593   :  { %v1829_v14 = vmul.f32 %v2838_v8, %v1827_v1  ;;  %v2282_v1 = vld [vmem:[%s3547_s7] ss:$0 sm:$0xff]  ;;  %s3065_s7 = smov [#allocation13]  }
0x2594   :  { %s2209_s29 = sshll.u32 %s3065_s7, 4  ;;  %s2210_s29 = int_to_ptr.vmem [resolvable:$true] %s2209_s29 }
0x2595   :  { %1831 = vrot.lane.b32.xlu0 %v1829_v14, %s3052_s23  ;;  %s2975_s11 = scalar_lea.vmem %s2210_s29, 64  ;;  %p2980_p13 = scmp.lt.s32.totalorder %s2210_s29, %s2210_s29 }
0x2596   :  { %p2976_p12 = scmp.ne.s32.totalorder %s2210_s29, %s2975_s11  ;;  %p2981_p0 = scmp.lt.s32.totalorder %s2975_s11, %s2975_s11 }
0x2598   :  { %p2982_p1 = por %p2981_p0, %p2980_p13 }
0x259a   :  { %p2983_p2 = pnand %p2982_p1, %p2976_p12 }
0x2607   :  { %v1832_v10 = vpop.permute.xlu0 %1831 }
0x2608   :  { %v1834_v11 = vadd.f32 %v1832_v10, %v1824_v18 }
0x260a   :  { %2839 = vtanh.f32 %v1834_v11  ;;  %v1933_v35 = vrot.slane %v1834_v11, 6 }
0x2614   :  { %v2840_v12 = vpop.eup %2839 }
0x2615   :  { %1837 = vrot.lane.b32.xlu1 %v2840_v12, %s3063_s20 }
0x2687   :  { %v1838_v13 = vpop.permute.xlu1 %1837 }
0x2688   :  { %v3455_v15 = vmul.f32 %v2838_v8, %v1838_v13 }
0x268a   :  { %v1846_v16 = vrot.slane %v3455_v15, 2 }
0x268c   :  { %1847 = vrot.lane.b32.xlu0 %v1846_v16, %s3052_s23 }
0x26fe   :  { %v1848_v17 = vpop.permute.xlu0 %1847 }
0x26ff   :  { %2568 = vmatmul.mubr.msk.f32.vlgmr.msra.gmra.mrb[16].mxu0 %vm115_vm1, %v1848_v17 }
0x27d2   :  { %v1917_v21 = vpop.f32.mrb[16].mxu0 }
0x27d3   :  { %v1922_v22 = vrot.slane %v1917_v21, 4  ;;  %v2569_v25 = vpop.f32.mrb[17].mxu0 }
0x27d5   :  { %v1924_v27 = vadd.f32 %v1922_v22, %v3378_v24 }
0x27d7   :  { %2841 = vtanh.f32 %v1924_v27  ;;  %v2279_v29 = vmul.f32 -1.442695, %v1924_v27 }
0x27d9   :  { %2843 = vpow2.f32 %v2279_v29 }
0x27e1   :  { %v2842_v28 = vpop.eup %2841 }
0x27e2   :  { %1937 = vrot.lane.b32.xlu1 %v2842_v28, %s3063_s20 }
0x27e3   :  { %v2844_v30 = vpop.eup %2843 }
0x27e4   :  { %v1928_v31 = vadd.f32 1.0, %v2844_v30 }
0x27e6   :  { %2845 = vrcp.f32 %v1928_v31 }
0x27f0   :  { %v2846_v32 = vpop.eup %2845 }
0x27f1   :  { %v1935_v36 = vmul.f32 %v2846_v32, %v1933_v35 }
0x2854   :  { %v1938_v33 = vpop.permute.xlu1 %1937 }
0x2855   :  { %v1940_v34 = vmul.f32 %v2846_v32, %v1938_v33 }
0x2857   :  { %1942 = vrot.lane.b32.xlu0 %v1940_v34, %s3052_s23 }
0x28c9   :  { %v1943_v37 = vpop.permute.xlu0 %1942 }
0x28ca   :  { %v1945_v23 = vadd.f32 %v1943_v37, %v1935_v36 }
0x28cc   :  { %2847 = vtanh.f32 %v1945_v23 }
0x28d6   :  { %v2848_v38 = vpop.eup %2847 }
0x28d7   :  { %1948 = vrot.lane.b32.xlu1 %v2848_v38, %s3063_s20 }
0x2949   :  { %v1949_v40 = vpop.permute.xlu1 %1948 }
0x294a   :  { %v1951_v26 = vmul.f32 %v2846_v32, %v1949_v40 }
0x294c   :  { %v1957_v41 = vrot.slane %v1951_v26, 4 }
0x294e   :  { %1958 = vrot.lane.b32.xlu0 %v1957_v41, %s3052_s23 }
0x29c0   :  { %v1959_v43 = vpop.permute.xlu0 %1958 }
0x29c1   :  { %2579 = vmatmul.mubr.msk.f32.vlgmr.msra.gmra.mrb[16].mxu1 %vm115_vm1, %v1959_v43 }
0x2a94   :  { %v2028_v44 = vpop.f32.mrb[16].mxu1 }
0x2a95   :  { %v2033_v45 = vrot.slane %v2028_v44, 2  ;;  %v2580_v46 = vpop.f32.mrb[17].mxu1 }
0x2a97   :  { %v2035_v47 = vadd.f32 %v2033_v45, %v3378_v24  ;;  %v2044_v24 = vrot.slane %v1945_v23, 6 }
0x2a99   :  { %2849 = vtanh.f32 %v2035_v47  ;;  %v2281_v49 = vmul.f32 -1.442695, %v2035_v47 }
0x2a9b   :  { %2851 = vpow2.f32 %v2281_v49 }
0x2aa3   :  { %v2850_v48 = vpop.eup %2849 }
0x2aa4   :  { %2048 = vrot.lane.b32.xlu1 %v2850_v48, %s3063_s20 }
0x2aa5   :  { %v2852_v50 = vpop.eup %2851 }
0x2aa6   :  { %v2039_v51 = vadd.f32 1.0, %v2852_v50 }
0x2aa8   :  { %2853 = vrcp.f32 %v2039_v51 }
0x2ab2   :  { %v2854_v52 = vpop.eup %2853 }
0x2ab3   :  { %v2046_v54 = vmul.f32 %v2854_v52, %v2044_v24 }
0x2b16   :  { %v2049_v20 = vpop.permute.xlu1 %2048 }
0x2b17   :  { %v2051_v53 = vmul.f32 %v2854_v52, %v2049_v20 }
0x2b19   :  { %2053 = vrot.lane.b32.xlu0 %v2051_v53, %s3052_s23 }
0x2b1d   :  { %1404 = vrot.lane.b32.xlu0 %v3399_v59, %s3052_s23  ;;  %v2078_v59 = vld [vmem:[#allocation11] sm:$0xff] }
0x2b21   :  { %1626 = vrot.lane.b32.xlu0 %v3429_v42, %s3052_s23  ;;  %v2079_v42 = vld [vmem:[#allocation11 + $0x8] sm:$0xff] }
0x2b22   :  { %v2704_v62 = vpack.c.bf16 %v2079_v42, %v2078_v59 }
0x2b24   :  { %2705 = vmatprep.subr.bf16.mxu0 %v2704_v62 }
0x2b25   :  { %1953 = vrot.lane.b32.xlu0 %v1951_v26, %s3052_s23  ;;  %2707 = vmatpush3.bf16.msra.mxu0 %v2704_v62 }
0x2b26   :  { %2709 = vmatprep.subr.bf16.mxu0 %v2708_v4 }
0x2b29   :  { %2711 = vmatpush3.bf16.msra.mxu0 %v2708_v4 }
0x2b8b   :  { %v2054_v56 = vpop.permute.xlu0 %2053 }
0x2b8c   :  { %v2056_v57 = vadd.f32 %v2054_v56, %v2046_v54 }
0x2b8e   :  { %2855 = vtanh.f32 %v2056_v57 }
0x2b8f   :  { %v1405_v58 = vpop.permute.xlu0 %1404 }
0x2b90   :  { %1407 = vst.msk [vmem:[#allocation2] sm:$0xc] %vm418_vm3, %v1405_v58 }
0x2b93   :  { %v1627_v39 = vpop.permute.xlu0 %1626 }
0x2b94   :  { %1629 = vst.msk [vmem:[#allocation2] sm:$0xc0] %vm642_vm4, %v1627_v39 }
0x2b97   :  { %v1954_v60 = vpop.permute.xlu0 %1953 }
0x2b98   :  { %v2856_v61 = vpop.eup %2855  ;;  %1956 = vst.msk [vmem:[#allocation2 + $0x8] sm:$0x30] %vm530_vm5, %v1954_v60 }
0x2b99   :  { %2059 = vrot.lane.b32.xlu1 %v2856_v61, %s3063_s20 }
0x2b9d   :  { %1515 = vrot.lane.b32.xlu1 %v3414_v19, %s3052_s23 }
0x2ba1   :  { %1842 = vrot.lane.b32.xlu1 %v3455_v15, %s3052_s23 }
0x2c0b   :  { %v2060_v9 = vpop.permute.xlu1 %2059 }
0x2c0c   :  { %v2062_v5 = vmul.f32 %v2854_v52, %v2060_v9 }
0x2c0e   :  { %2064 = vrot.lane.b32.xlu1 %v2062_v5, %s3052_s23 }
0x2c0f   :  { %v1516_v6 = vpop.permute.xlu1 %1515 }
0x2c10   :  { %1518 = vst.msk [vmem:[#allocation2] sm:$0x30] %vm530_vm5, %v1516_v6 }
0x2c13   :  { %v1843_v19 = vpop.permute.xlu1 %1842 }
0x2c14   :  { %1845 = vst.msk [vmem:[#allocation2 + $0x8] sm:$0xc] %vm418_vm3, %v1843_v19 }
0x2c17   :  { %v2076_v7 = vld [vmem:[#allocation2] sm:$0xff] }
0x2c18   :  { %2589 = vmatprep.mubr.msk.f32.mxu0 %vm115_vm1, %v2076_v7 }
0x2c80   :  { %v2065_v3 = vpop.permute.xlu1 %2064 }
0x2c81   :  { %2067 = vst.msk [vmem:[#allocation2 + $0x8] sm:$0xc0] %vm642_vm4, %v2065_v3  ;;  %2069 = vst.msk [vmem:[#allocation13 - $0x4] sm:$0xc0] %vm642_vm4, %v2065_v3 }
0x2c88   :  { %v2077_v8 = vld [vmem:[#allocation2 + $0x8] sm:$0xff] }
0x2c89   :  { %2590 = vmatmul.mubr.msk.f32.vlgmr.msra.gmra.mrb[18].mxu0 %vm115_vm1, %v2077_v8 }
0x2d5c   :  { %v2591_v14 = vpop.f32.mrb[18].mxu0 }
0x2d5d   :  { %v2167_v0 = vadd.f32 %v2591_v14, %v2282_v1  ;;  %v2161_v18 = vpop.f32.mrb[19].mxu0 }
0x2d5e   :  { %v2162_v10 = vadd.f32 %v2282_v1, %v2161_v18 }
0x2d5f   :  { %2172 = vmax.xlane.f32.xlu1 %v2167_v0 }
0x2d60   :  { %2170 = vmax.xlane.f32.xlu0 %v2162_v10 }
0x2d70   :  { %1084 = vrot.lane.b32.xlu1 %v3331_v55, %s3064_s30 }
0x2dec   :  { %v2173_v11 = vpop.xlane.xlu1 %2172 }
0x2ded   :  { %v2175_v12 = vsub.f32 %v2167_v0, %v2173_v11  ;;  %v2171_v13 = vpop.xlane.xlu0 %2170 }
0x2dee   :  { %v2174_v15 = vsub.f32 %v2162_v10, %v2171_v13 }
0x2def   :  { %v2178_v16 = vmul.f32 1.442695, %v2175_v12 }
0x2df0   :  { %v1085_v17 = vpop.permute.xlu1 %1084  ;;  %v2176_v21 = vmul.f32 1.442695, %v2174_v15 }
0x2df1   :  { %2857 = vpow2.f32 %v2178_v16  ;;  %1087 = vst.msk [vmem:[#allocation15 - $0x6] sm:$0xc0] %vm642_vm4, %v1085_v17 }
0x2df2   :  { %2859 = vpow2.f32 %v2176_v21 }
0x2dfb   :  { %v2858_v22 = vpop.eup %2857 }
0x2dfc   :  { %2182 = vadd.xlane.f32.xlu0 %v2858_v22  ;;  %v2860_v25 = vpop.eup %2859 }
0x2e00   :  { %2180 = vadd.xlane.f32.xlu0 %v2860_v25 }
0x2e16   :  { %2071 = vrot.lane.b32.xlu0 %v2056_v57, %s3064_s30 }
0x2e17   :  { %2986 = shalt.err (!%p2983_p2)
}
0x2e18   :  { %s2987_s4 = scalar_lea.hbm %s3549_s9, 64 }
0x2e19   :  { %p2988_p3 = scmp.ne.s32.totalorder %s3549_s9, %s2987_s4  ;;  %p2991_p4 = scmp.lt.u32.totalorder %s2987_s4, %s3549_s9 }
0x2e1b   :  { %p2993_p5 = pnand %p2991_p4, %p2988_p3 }
0x2e1d   :  { %2996 = shalt.err (!%p2993_p5)
}
0x2e1e   :  { %2215 = dma.vmem_to_hbm [thread:$0]  %s2210_s29, 64, %s3549_s9, [#allocation14], %s3052_s23, %s3052_s23, %s3053_s24  }
0x2e1f   :  { %s3066_s6 = smov [#allocation15]  }
0x2e20   :  { %s2221_s18 = sshll.u32 %s3066_s6, 4  ;;  %s2222_s18 = int_to_ptr.vmem [resolvable:$true] %s2221_s18 }
0x2e21   :  { %s2997_s20 = scalar_lea.vmem %s2222_s18, 64  ;;  %p3002_p7 = scmp.lt.s32.totalorder %s2222_s18, %s2222_s18 }
0x2e22   :  { %p2998_p6 = scmp.ne.s32.totalorder %s2222_s18, %s2997_s20  ;;  %p3003_p8 = scmp.lt.s32.totalorder %s2997_s20, %s2997_s20 }
0x2e24   :  { %p3004_p9 = por %p3003_p8, %p3002_p7 }
0x2e26   :  { %p3005_p10 = pnand %p3004_p9, %p2998_p6 }
0x2e89   :  { %v2183_v55 = vpop.xlane.xlu0 %2182 }
0x2e8a   :  { %2861 = vlog2.f32 %v2183_v55 }
0x2e8d   :  { %v2181_v27 = vpop.xlane.xlu0 %2180 }
0x2e8e   :  { %2863 = vlog2.f32 %v2181_v27 }
0x2e91   :  { %v2072_v28 = vpop.permute.xlu0 %2071 }
0x2e92   :  { %2075 = vst.msk [vmem:[#allocation15 - $0x4] sm:$0xc0] %vm642_vm4, %v2072_v28 }
0x2e93   :  { %3008 = shalt.err (!%p3005_p10)
}
0x2e94   :  { %s3009_s9 = scalar_lea.hbm %s3550_s10, 64 }
0x2e95   :  { %p3010_p11 = scmp.ne.s32.totalorder %s3550_s10, %s3009_s9  ;;  %p3013_p12 = scmp.lt.u32.totalorder %s3009_s9, %s3550_s10 }
0x2e97   :  { %p3015_p13 = pnand %p3013_p12, %p3010_p11 }
0x2e99   :  { %3018 = shalt.err (!%p3015_p13)
}
0x2e9a   :  { %2227 = dma.vmem_to_hbm [thread:$0]  %s2222_s18, 64, %s3550_s10, [#allocation14], %s3052_s23, %s3052_s23, %s3053_s24   ;;  %v2862_v29 = vpop.eup %2861 }
0x2e9b   :  { %v2187_v30 = vmul.f32 0.6931472, %v2862_v29  ;;  %v2864_v32 = vpop.eup %2863  ;;  %s3067_s30 = smov [#allocation12]  }
0x2e9c   :  { %s2197_s7 = sshll.u32 %s3067_s30, 4  ;;  %v2185_v33 = vmul.f32 0.6931472, %v2864_v32  ;;  %s2198_s7 = int_to_ptr.vmem [resolvable:$true] %s2197_s7 }
0x2e9d   :  { %v2189_v31 = vsub.f32 %v2175_v12, %v2187_v30  ;;  %s3019_s29 = scalar_lea.vmem %s2198_s7, 256  ;;  %p3024_p1 = scmp.lt.s32.totalorder %s2198_s7, %s2198_s7 }
0x2e9e   :  { %v2188_v34 = vsub.f32 %v2174_v15, %v2185_v33  ;;  %p3020_p0 = scmp.ne.s32.totalorder %s2198_s7, %s3019_s29  ;;  %p3025_p2 = scmp.lt.s32.totalorder %s3019_s29, %s3019_s29 }
0x2e9f   :  { %2191 = vst [vmem:[#allocation12 + $0x8] sm:$0xff] %v2189_v31 }
0x2ea0   :  { %2190 = vst [vmem:[#allocation12] sm:$0xff] %v2188_v34  ;;  %p3026_p3 = por %p3025_p2, %p3024_p1 }
0x2ea2   :  { %p3027_p4 = pnand %p3026_p3, %p3020_p0 }
0x2ea4   :  { %3030 = shalt.err (!%p3027_p4)
}
0x2ea5   :  { %s3031_s23 = scalar_lea.hbm %s3548_s8, 256 }
0x2ea6   :  { %p3032_p5 = scmp.ne.s32.totalorder %s3548_s8, %s3031_s23  ;;  %p3035_p6 = scmp.lt.u32.totalorder %s3031_s23, %s3548_s8 }
0x2ea8   :  { %p3037_p7 = pnand %p3035_p6, %p3032_p5 }
0x2eaa   :  { %3040 = shalt.err (!%p3037_p7)
}
0x2eab   :  { %2203 = dma.vmem_to_hbm [thread:$0]  %s2198_s7, 256, %s3548_s8, [#allocation5], %s3056_s14, %s3056_s14, %s3057_s19  }
0x2eac   :  { %3047 = dma.done.wait [#allocation5], 256  }
0x2ead   :  { %3048 = vsyncadd [#allocation5], 4294967040 }
0x2eae   :  { %3049 = dma.done.wait [#allocation14], 128  }
0x2eaf   :  { %3050 = vsyncadd [#allocation14], 4294967168 }
0x2eb0   :  { %2237 = vsyncpa [#allocation4], 1 }
0x2eb1   :  { %2238 = vsyncpa [#allocation7], 1 }
0x2eb2   :  { %2239 = vsyncpa [#allocation10], 1 }
0x2eb3   :  { %2240 = vsyncpa [#allocation5], 1 }
0x2eb4   :  { %2241 = vsyncpa [#allocation14], 1 }

</bundles_post_ra>
